<compile_context>
chip_gen: v6e
topology: v6e:2x2x1
jax: 0.10.0
libtpu: 0.0.40
codegen_flags: <defaults>
</compile_context>

<pallas_src>
import jax
import jax.numpy as jnp
from jax.experimental import pallas as pl
from jax.experimental.pallas import tpu as pltpu

_HALO_W = 128  # lanes of the next tile fetched for the halo (J - 1 <= 128 required)


def _make_encoder_kernel(num_shifts, tile_l, apply_relu):
    """num_shifts = ceil(K / stride); tile_l = L-tile size (multiple of 128)."""

    if num_shifts == 1:
        # K <= stride: frames never cross the tile boundary, no halo operand at all.
        def kernel(x_ref, w_ref, o_ref):
            acc = jnp.dot(
                w_ref[...], x_ref[0],
                preferred_element_type=jnp.float32,
                precision=jax.lax.Precision.HIGHEST)
            if apply_relu:
                acc = jnp.maximum(acc, 0.0)
            o_ref[0] = acc.astype(o_ref.dtype)

        return kernel

    def kernel(x_ref, halo_ref, w_ref, o_ref):
        # x_ref:    (1, CS, TL)      deinterleaved waveform, current L-tile
        # halo_ref: (1, CS, 128)     first 128 columns of the next L-tile
        # w_ref:    (C_out, J*CS)    stacked resident weights
        # o_ref:    (1, C_out, TL)   conv-layout output tile
        x_cur = x_ref[0]                                   # (CS, TL)
        halo = halo_ref[0]                                 # (CS, 128)
        cs = x_cur.shape[0]

        if tile_l > _HALO_W:
            h = jnp.concatenate(
                [halo, jnp.zeros((cs, tile_l - _HALO_W), halo.dtype)], axis=1)
        else:
            h = halo

        lane = jax.lax.broadcasted_iota(jnp.int32, (cs, tile_l), 1)

        # Column p of the j-shifted frame view is x_t[:, l0 + p + j].  Select-then-roll:
        # only the first j (< 128) lanes need the next-tile halo, so merge first, then a
        # single XLU roll per shift.
        pieces = [x_cur]
        for j in range(1, num_shifts):
            z = jnp.where(lane < j, h, x_cur)
            pieces.append(pltpu.roll(z, tile_l - j, 1))

        xf = jnp.concatenate(pieces, axis=0)               # (J*CS, TL)
        acc = jnp.dot(
            w_ref[...], xf,
            preferred_element_type=jnp.float32,
            precision=jax.lax.Precision.HIGHEST)           # single fused MXU call
        if apply_relu:
            acc = jnp.maximum(acc, 0.0)
        o_ref[0] = acc.astype(o_ref.dtype)

    return kernel


def encoder_forward(x, weight, stride, nonlinear=None, tile_l=2048):
    """Forward pass of the TasNet Encoder.

    x:      (B, Cin, T) float32 waveform
    weight: (C_out, Cin, K) conv1d weight (bias=False)
    Returns (B, C_out, L) with L = (T - K)//stride + 1, optionally ReLU'd.
    """
    if nonlinear not in (None, "relu"):
        raise NotImplementedError("Not support {}".format(nonlinear))

    B, Cin, T = x.shape
    C_out, Cin_w, K = weight.shape
    assert Cin_w == Cin
    s = int(stride)
    assert T >= K
    L = (T - K) // s + 1

    J = -(-K // s)                                  # ceil(K / stride): shifts per frame
    assert J - 1 <= _HALO_W, "kernel_size/stride too large for the 128-lane halo"
    Kp = J * s
    CS = Cin * s

    # Lane-dense output tile; never wider than the (128-rounded) output length.
    TL = max(128, (int(tile_l) // 128) * 128)
    TL = min(TL, -(-L // 128) * 128)

    # Clamp TL so the double-buffered working set stays well inside the scoped-VMEM
    # budget that is safe on every generation (~48 MiB usable on v7x).
    def _vmem_est(tl):
        per_step = (CS * tl + (CS * _HALO_W if J > 1 else 0) + C_out * tl) * 4
        return 2 * per_step + C_out * J * CS * 4
    while TL > 128 and _vmem_est(TL) > 40 * 1024 * 1024:
        TL = max(128, (TL // 2) // 128 * 128)

    n_tiles = -(-L // TL)
    halo_cols = _HALO_W if J > 1 else 0
    Tcols = n_tiles * TL + halo_cols                # minimal padding: +128 halo columns
    Tpad = Tcols * s

    # Deinterleave the waveform once (pure reshape+transpose, no K/stride-duplicated
    # frames tensor): x_t[b, ci*s + r, t] = x[b, ci, t*s + r].
    x_cut = x[:, :, : min(T, Tpad)]
    x_p = jnp.pad(x_cut, ((0, 0), (0, 0), (0, Tpad - x_cut.shape[-1])))
    x_t = x_p.reshape(B, Cin, Tcols, s).transpose(0, 1, 3, 2).reshape(B, CS, Tcols)

    # Weights -> single stacked matrix (C_out, J*CS):
    #   w_stack[c, j*CS + ci*s + r] = weight[c, ci, j*s + r]  (zero pad K..Kp-1)
    w_p = jnp.pad(weight, ((0, 0), (0, 0), (0, Kp - K)))
    w_r = w_p.reshape(C_out, Cin, J, s).transpose(2, 0, 1, 3).reshape(J, C_out, CS)
    w_stack = w_r.transpose(1, 0, 2).reshape(C_out, J * CS).astype(x.dtype)

    kernel = _make_encoder_kernel(J, TL, nonlinear == "relu")

    itemsize = jnp.dtype(x.dtype).itemsize
    flops = 2 * B * L * C_out * Cin * K
    bytes_accessed = int(
        B * CS * (n_tiles * TL + n_tiles * halo_cols) * itemsize   # input (+halo dup)
        + w_stack.size * itemsize                                  # resident weights
        + B * C_out * L * itemsize)                                # exact-L output

    blocks_per_tile = TL // 128
    in_specs = [pl.BlockSpec((1, CS, TL), lambda b, lt: (b, 0, lt))]   # current L-tile
    operands = [x_t]
    if J > 1:
        # Narrow halo: first 128 columns of the next L-tile (index in 128-wide blocks).
        in_specs.append(
            pl.BlockSpec((1, CS, _HALO_W),
                         lambda b, lt: (b, 0, (lt + 1) * blocks_per_tile)))
        operands.append(x_t)
    in_specs.append(pl.BlockSpec((C_out, J * CS), lambda b, lt: (0, 0)))  # resident W
    operands.append(w_stack)

    out = pl.pallas_call(
        kernel,
        out_shape=jax.ShapeDtypeStruct((B, C_out, L), x.dtype),    # exact L, no slice
        grid=(B, n_tiles),
        in_specs=in_specs,
        out_specs=pl.BlockSpec((1, C_out, TL), lambda b, lt: (b, 0, lt)),
        compiler_params=pltpu.CompilerParams(
            dimension_semantics=("parallel", "parallel"),
            vmem_limit_bytes=48 * 1024 * 1024,
        ),
        cost_estimate=pl.CostEstimate(
            flops=flops, transcendentals=0, bytes_accessed=bytes_accessed),
    )(*operands)

    return out


# ----------------------------------------------------------------------------
# Demo / correctness check.
# ----------------------------------------------------------------------------
if __name__ == "__main__":

    def run_case(B, in_channels, n_bases, kernel_size, stride, T, nonlinear, tl, key):
        kx, kw = jax.random.split(key)
        x = jax.random.normal(kx, (B, in_channels, T), dtype=jnp.float32)
        bound = 1.0 / float(in_channels * kernel_size) ** 0.5
        w = jax.random.uniform(
            kw, (n_bases, in_channels, kernel_size),
            dtype=jnp.float32, minval=-bound, maxval=bound)

        y = encoder_forward(x, w, stride, nonlinear=nonlinear, tile_l=tl)
        y = jax.block_until_ready(y)

        y_ref = jax.lax.conv_general_dilated(
            x, w, window_strides=(stride,), padding="VALID",
            dimension_numbers=("NCH", "OIH", "NCH"),
            precision=jax.lax.Precision.HIGHEST)
        if nonlinear == "relu":
            y_ref = jnp.maximum(y_ref, 0.0)

        assert y.shape == y_ref.shape, (y.shape, y_ref.shape)
        assert jnp.allclose(y, y_ref, atol=1e-3, rtol=1e-3), float(
            jnp.max(jnp.abs(y - y_ref)))

    key = jax.random.PRNGKey(0)
    k1, k2, k3, k4 = jax.random.split(key, 4)

    # TasNet-style mono waveform, large tile: 3 L-tiles, ragged last block, halo crossing.
    run_case(B=2, in_channels=1, n_bases=64, kernel_size=16, stride=8,
             T=16400, nonlinear=None, tl=1024, key=k1)
    # Optional ReLU branch, smaller tile so the halo crosses a tile edge with valid frames.
    run_case(B=2, in_channels=1, n_bases=64, kernel_size=16, stride=8,
             T=4096, nonlinear="relu", tl=256, key=k2)
    # Multi-channel input + kernel_size not a multiple of stride (weight padding, TL==128).
    run_case(B=2, in_channels=2, n_bases=32, kernel_size=12, stride=8,
             T=2064, nonlinear=None, tl=128, key=k3)
    # K == stride (J == 1): no-halo kernel variant.
    run_case(B=2, in_channels=1, n_bases=16, kernel_size=8, stride=8,
             T=1032, nonlinear=None, tl=1024, key=k4)

    print("KERNEL_OK")
</pallas_src>

<mosaic_0001>
module attributes {stable_mosaic.version = 11 : i64} {
  func.func @kernel(%arg0: i32, %arg1: i32, %arg2: memref<1x8x1024xf32, #tpu.memory_space<vmem>>, %arg3: memref<1x8x128xf32, #tpu.memory_space<vmem>>, %arg4: memref<64x16xf32, #tpu.memory_space<vmem>>, %arg5: memref<1x64x1024xf32, #tpu.memory_space<vmem>>) attributes {dimension_semantics = [#tpu.dimension_semantics<parallel>, #tpu.dimension_semantics<parallel>], iteration_bounds = array<i64: 2, 3>, scalar_prefetch = 0 : i64, scratch_operands = 0 : i64, tpu.core_type = #tpu.core_type<tc>, window_params = [{transform_indices = @transform_0, window_bounds = array<i64: 1, 8, 1024>}, {transform_indices = @transform_1, window_bounds = array<i64: 1, 8, 128>}, {pipeline_mode = #tpu.pipeline_mode<synchronous>, transform_indices = @transform_2, window_bounds = array<i64: 64, 16>}, {transform_indices = @transform_3, window_bounds = array<i64: 1, 64, 1024>}]} {
    %c0 = arith.constant 0 : index
    %c0_0 = arith.constant 0 : index
    %c0_1 = arith.constant 0 : index
    %0 = vector.load %arg2[%c0, %c0_0, %c0_1] : memref<1x8x1024xf32, #tpu.memory_space<vmem>>, vector<1x8x1024xf32>
    %1 = vector.shape_cast %0 : vector<1x8x1024xf32> to vector<8x1024xf32>
    %c0_2 = arith.constant 0 : index
    %c0_3 = arith.constant 0 : index
    %c0_4 = arith.constant 0 : index
    %2 = vector.load %arg3[%c0_2, %c0_3, %c0_4] : memref<1x8x128xf32, #tpu.memory_space<vmem>>, vector<1x8x128xf32>
    %3 = vector.shape_cast %2 : vector<1x8x128xf32> to vector<8x128xf32>
    %cst = arith.constant 0.000000e+00 : f32
    %4 = vector.broadcast %cst : f32 to vector<8x896xf32>
    %5 = tpu.concatenate %3, %4 in 1 : vector<8x128xf32>, vector<8x896xf32> -> vector<8x1024xf32>
    %6 = tpu.iota {dimensions = array<i32: 1>} : vector<8x1024xi32>
    %c1_i32 = arith.constant 1 : i32
    %7 = vector.broadcast %c1_i32 : i32 to vector<8x1024xi32>
    %8 = arith.cmpi slt, %6, %7 : vector<8x1024xi32>
    %9 = arith.select %8, %5, %1 : vector<8x1024xi1>, vector<8x1024xf32>
    %c1023_i32 = arith.constant 1023 : i32
    %10 = tpu.dynamic_rotate %9 by %c1023_i32 dim 1 : vector<8x1024xf32>, i32 -> vector<8x1024xf32>
    %11 = tpu.concatenate %1, %10 in 0 : vector<8x1024xf32>, vector<8x1024xf32> -> vector<16x1024xf32>
    %c0_5 = arith.constant 0 : index
    %c0_6 = arith.constant 0 : index
    %12 = vector.load %arg4[%c0_5, %c0_6] : memref<64x16xf32, #tpu.memory_space<vmem>>, vector<64x16xf32>
    %cst_7 = arith.constant dense<0.000000e+00> : vector<64x1024xf32>
    %13 = tpu.matmul %12, %11, %cst_7 {dimension_numbers = #tpu.dot_dimension_numbers<[1], [0], [0], [1], [0, 0, 1, 1], [], []>, precision = #tpu.contract_precision<fp32>} : vector<64x16xf32>, vector<16x1024xf32>, vector<64x1024xf32> -> vector<64x1024xf32>
    %c0_8 = arith.constant 0 : index
    %c0_9 = arith.constant 0 : index
    %c0_10 = arith.constant 0 : index
    %14 = vector.load %arg5[%c0_8, %c0_9, %c0_10] : memref<1x64x1024xf32, #tpu.memory_space<vmem>>, vector<1x64x1024xf32>
    %15 = vector.shape_cast %14 : vector<1x64x1024xf32> to vector<64x1024xf32>
    %16 = vector.shape_cast %13 : vector<64x1024xf32> to vector<1x64x1024xf32>
    tpu.vector_store %arg5[%c0_8, %c0_9, %c0_10], %16 {strides = array<i32>} : memref<1x64x1024xf32, #tpu.memory_space<vmem>>, vector<1x64x1024xf32>,
    return
  }
  func.func @transform_0(%arg0: i32, %arg1: i32) -> (i32, i32, i32) {
    %c0_i32 = arith.constant 0 : i32
    %c0_i32_0 = arith.constant 0 : i32
    return %arg0, %c0_i32, %arg1 : i32, i32, i32
  }
  func.func @transform_1(%arg0: i32, %arg1: i32) -> (i32, i32, i32) {
    %c1_i32 = arith.constant 1 : i32
    %0 = arith.addi %arg1, %c1_i32 : i32
    %c8_i32 = arith.constant 8 : i32
    %1 = arith.muli %0, %c8_i32 : i32
    %c0_i32 = arith.constant 0 : i32
    %c0_i32_0 = arith.constant 0 : i32
    return %arg0, %c0_i32, %1 : i32, i32, i32
  }
  func.func @transform_2(%arg0: i32, %arg1: i32) -> (i32, i32) {
    %c0_i32 = arith.constant 0 : i32
    %c0_i32_0 = arith.constant 0 : i32
    %c0_i32_1 = arith.constant 0 : i32
    return %c0_i32, %c0_i32_0 : i32, i32
  }
  func.func @transform_3(%arg0: i32, %arg1: i32) -> (i32, i32, i32) {
    %c0_i32 = arith.constant 0 : i32
    %c0_i32_0 = arith.constant 0 : i32
    return %arg0, %c0_i32, %arg1 : i32, i32, i32
  }
}

</mosaic_0001>

<bundles_post_ra>
// kernel: tpu_custom_call.1
= control target key start
LH: loop header
LB: loop body
LE: loop exit
PB: predicated region body
PF: predicated region fallthrough
CT: control target
= control target key end

     0   :  { %s6096_s0 = inlined_call_operand.hbm [shape: f32[2,8,3200], index: 0, kind: input, shape index: {}]   ;;  %s6097_s1 = inlined_call_operand.hbm [shape: f32[2,8,3200], index: 1, kind: input, shape index: {}]   ;;  %s6098_s2 = inlined_call_operand.vmem [shape: f32[64,16], index: 2, kind: input, shape index: {}]   ;;  %s6099_s3 = inlined_call_operand.hbm [shape: f32[2,64,2049], index: 3, kind: output, shape index: {}]  }
   0x1   :  { %6155 = sst [smem:[#allocation71_spill]] %s6096_s0 }
   0x2   :  { %6156 = sst [smem:[#allocation72_spill]] %s6099_s3 }
   0x3   :  { %8 = vsyncpa [#allocation3], 0 }
   0x4   :  { %10 = vsyncpa [#allocation3 + $0x1], 0 }
   0x5   :  { %11 = vsyncpa [#allocation6], 0 }
   0x6   :  { %13 = vsyncpa [#allocation6 + $0x1], 0 }
   0x7   :  { %14 = vsyncpa [#allocation4], 0 }
   0x8   :  { %16 = vsyncpa [#allocation4 + $0x1], 0  ;;  %s4251_s12 = smov 0   ;;  %s4253_s13 = smov 0  }
   0x9   :  { %s4255_s14 = smov 0   ;;  %s4257_s15 = smov 0  }
   0xa   :  { %s4259_s16 = smov 0   ;;  %s4261_s17 = smov 0  }
   0xb   :  { %s4263_s18 = smov 0   ;;  %s4265_s19 = smov 0  }
   0xc   :  { %s4267_s20 = smov 0   ;;  %s4269_s21 = smov 0  }
   0xd   :  { %s4271_s22 = smov 0  }
   0xe LB: > { %6157 = sst [smem:[#allocation11_spill]] %s4194_s15  ;;  %s6100_s23 = sadd.s32 4294967295, %s4222_s22   ;;  %s4222_s22 = sphi %s4271_s22, %s22_s22   ;;  %s4218_s21 = sphi %s4269_s21, %s6394_s21   ;;  %s4214_s20 = sphi %s4267_s20, %s6385_s20   ;;  %s4210_s19 = sphi %s4265_s19, %s6393_s19   ;;  %s4206_s18 = sphi %s4263_s18, %s6384_s18   ;;  %s4202_s17 = sphi %s4261_s17, %s6392_s17   ;;  %s4198_s16 = sphi %s4259_s16, %s6391_s16   ;;  %s4194_s15 = sphi %s4257_s15, %s6390_s15   ;;  %s4190_s14 = sphi %s4255_s14, %s6389_s14   ;;  %s4186_s13 = sphi %s4253_s13, %s6388_s13   ;;  %s4182_s12 = sphi %s4251_s12, %s6387_s12  }
   0xf   : > { %6158 = sst [smem:[#allocation12_spill]] %s4214_s20  ;;  %s31_s25 = sadd.s32 1, %s4214_s20 }
  0x10   : > { %s34_s26 = sadd.s32 1, %s4218_s21  ;;  %p32_p0 = scmp.ge.s32.totalorder %s31_s25, 3 }
  0x11   : > { %s43_s27 = sadd.s32 1, %s4202_s17  ;;  %p50_p1 = scmp.ne.s32.totalorder %s4202_s17, %s4198_s16 }
  0x12   : > { %p51_p2 = scmp.eq.s32.totalorder %s4222_s22, 0  ;;  %s6396_s25 = smov (%p32_p0, %s31_s25), 0 }
  0x13   : > { %6159 = sst [smem:[#allocation13_spill]] %s6396_s25  ;;  %s6398_s26 = smov (!%p32_p0, %s34_s26), %s4218_s21 }
  0x14   : > { %s39_s28 = ssub.s32 %s4214_s20, %s6396_s25  ;;  %p4324_p3 = por %p51_p2, %p50_p1 }
  0x15   : > { %p36_p4 = scmp.ge.s32.totalorder %s6398_s26, 2  ;;  %p56_p5 = scmp.ne.s32.totalorder %s4198_s16, %s4194_s15 }
  0x16   : > { %p4332_p6 = scmp.eq.s32.totalorder %s6100_s23, 0  ;;  %s4337_s4 = sshll.u32 %s4214_s20, 3 }
  0x17   : > { %s6400_s26 = smov (%p36_p4, %s6398_s26), 0  ;;  %s3933_s6 = sadd.s32 8, %s4337_s4 }
  0x18   : > { %6162 = sst [smem:[#allocation14_spill]] %s6400_s26  ;;  %p4346_p7 = por %p4332_p6, %p56_p5 }
  0x19   : > { %s38_s7 = ssub.s32 %s4218_s21, %s6400_s26  ;;  %s3934_s8 = sshll.u32 %s6396_s25, 3 }
  0x1a   : > { %s40_s9 = sor.u32 %s39_s28, %s38_s7  ;;  %s3935_s10 = sadd.s32 8, %s3934_s8 }
  0x1b   : > { %p41_p8 = scmp.eq.s32.totalorder %s40_s9, 0  ;;  %s71_s11 = ssub.s32 %s3933_s6, %s3935_s10 }
  0x1c   : > { %s72_s24 = sor.u32 %s71_s11, %s38_s7  ;;  %s75_s23 = sadd.s32 1, %s4190_s14 }
  0x1d   : > { %s4356_s20 = scalar_select %p41_p8, %s4202_s17, %s43_s27  }
  0x1e   : > { %p73_p9 = scmp.eq.s32.totalorder %s72_s24, 0  ;;  %p82_p10 = scmp.ne.s32.totalorder %s4190_s14, %s4186_s13 }
  0x1f   : > { %6164 = sst [smem:[#allocation15_spill]] %s4356_s20  ;;  %p88_p11 = scmp.ne.s32.totalorder %s4186_s13, %s4182_s12 }
  0x20   : > { %s6165_s3 = sadd.s32 4294967295, %s4222_s22   ;;  %p4369_p13 = por %p82_p10, %p51_p2 }
  0x21   : > { %p135_p12 = scmp.eq.s32.totalorder %s6165_s3, 5  ;;  %p4375_p0 = por %p88_p11, %p4332_p6 }
  0x22   : > { %s4365_s26 = scalar_select %p73_p9, %s4190_s14, %s75_s23  }
  0x23   : > { %p4382_p4 = por %p135_p12, %p50_p1  ;;  %s6170_s12 = sadd.s32 4294967294, %s4222_s22  }
  0x24   : > { %6166 = sst [smem:[#allocation16_spill]] %s4365_s26  ;;  %p141_p8 = scmp.eq.s32.totalorder %s6170_s12, 5 }
  0x25   : > { %p3907_p2 = scmp.ge.s32.totalorder %s4222_s22, 6 }
  0x26   : > { %p4391_p9 = por %p141_p8, %p56_p5 }
  0x27   : > { %160 = sbr.rel (%p3907_p2) target bundleno = 88 (0x58), region = 20 }
  0x28   : > { %s6171_s3 = scalar_select %p4391_p9, 1, 0 }
  0x2a   : > { %6172 = sst [smem:[#allocation17_spill]] %s6171_s3 }
  0x2c   : > { %163 = sbr.rel (!%p4324_p3) target bundleno = 71 (0x47), region = 24  ;;  %s164_s23 = sand.u32 (%p4324_p3), 1, %s4202_s17  }
  0x2d   : > { %s3908_s24 = sshll.u32 (%p4324_p3), %s164_s23, 6  ;;  %s165_s30 = scalar_lea.sflag (%p4324_p3), [#allocation3], %s164_s23 }
  0x2e   : > { %s168_s6 = scalar_lea.vmem (%p4324_p3), [#allocation2], %s3908_s24  ;;  %s3938_s7 = smul.u32 (%p4324_p3), 25, %s4218_s21 }
  0x2f   : > { %s184_s8 = sshll.u32 (%p4324_p3), %s168_s6, 4  ;;  %s6173_s0 = sld [smem:[#allocation71_spill]] (%p4324_p3)  ;;  %s185_s8 = int_to_ptr.vmem [resolvable:$true] %s184_s8 }
  0x30   : > { %s179_s9 = sadd.s32 (%p4324_p3), %s3938_s7, %s4337_s4 }
  0x31   : > { %s3912_s10 = sshll.u32 %s179_s9, 7 }
  0x35   : > { %s181_s20 = scalar_lea.hbm %s6173_s0, %s3912_s10  ;;  %s4047_s15 = scalar_lea.hbm %s6173_s0, 6400 }
  0x36   : > { %s4043_s26 = scalar_lea.hbm %s181_s20, 1024 }
  0x37   : > { %p4044_p1 = scmp.ne.s32.totalorder %s181_s20, %s4043_s26  ;;  %p4049_p3 = scmp.lt.s32.totalorder %s4047_s15, %s4043_s26 }
  0x39   : > { %p4051_p5 = pnand %p4049_p3, %p4044_p1 }
  0x3b   : > { %4054 = shalt.err (!%p4051_p5)
}
  0x3c   : > { %s4055_s23 = scalar_lea.vmem %s185_s8, 1024  ;;  %s4224_s24 = smov [#allocation2]  }
  0x3d   : > { %p4056_p6 = scmp.ne.s32.totalorder %s185_s8, %s4055_s23  ;;  %s4059_s6 = sshll.u32 %s4224_s24, 4  ;;  %s4060_s6 = int_to_ptr.vmem [resolvable:$false] %s4059_s6 }
  0x3e   : > { %s4061_s7 = scalar_lea.vmem %s4060_s6, 2048  ;;  %p4062_p10 = scmp.lt.s32.totalorder %s185_s8, %s4060_s6 }
  0x3f   : > { %p4063_p11 = scmp.lt.s32.totalorder %s4061_s7, %s4055_s23 }
  0x41   : > { %p4064_p12 = por %p4063_p11, %p4062_p10 }
  0x43   : > { %p4065_p8 = pnand %p4064_p12, %p4056_p6 }
  0x45   : > { %4068 = shalt.err (!%p4065_p8)
}
  0x46   : > { %187 = dma.hbm_to_vmem [thread:$0]  %s181_s20, 1024, %s185_s8, %s165_s30  }
  0x47 PF: > { %s191_s15 = sand.u32 1, %s4190_s14   ;;  %s3827_s26 = smul.u32 25, %s4218_s21 }
  0x48   : > { %s3915_s3 = sshll.u32 %s191_s15, 3  ;;  %s192_s7 = scalar_lea.sflag [#allocation6], %s191_s15 }
  0x49   : > { %s3828_s9 = sadd.s32 %s4337_s4, %s3827_s26  ;;  %s195_s11 = scalar_lea.vmem [#allocation5], %s3915_s3 }
  0x4a   : > { %s3917_s10 = sshll.u32 %s3828_s9, 7  ;;  %s206_s12 = sshll.u32 %s195_s11, 4  ;;  %s207_s12 = int_to_ptr.vmem [resolvable:$true] %s206_s12 }
  0x4b   : > { %s3830_s23 = scalar_lea.hbm %s6097_s1, %s3917_s10  ;;  %s4081_s20 = scalar_lea.vmem %s207_s12, 128 }
  0x4c   : > { %s3831_s6 = scalar_lea.hbm %s3830_s23, 1024  ;;  %p4082_p2 = scmp.ne.s32.totalorder %s207_s12, %s4081_s20 }
  0x4d   : > { %s4225_s30 = smov [#allocation5]  }
  0x4e   : > { %p4083_p1 = pnand %p4082_p2, %p4369_p13  ;;  %s4085_s8 = sshll.u32 %s4225_s30, 4  ;;  %s4086_s8 = int_to_ptr.vmem [resolvable:$false] %s4085_s8 }
  0x4f   : > { %s4087_s0 = scalar_lea.vmem %s4086_s8, 256  ;;  %p4088_p5 = scmp.lt.s32.totalorder %s207_s12, %s4086_s8 }
  0x50   : > { %p4084_p3 = pneg %p4083_p1  ;;  %p4089_p6 = scmp.lt.s32.totalorder %s4087_s0, %s4081_s20 }
  0x52   : > { %p4090_p10 = por %p4089_p6, %p4088_p5 }
  0x54   : > { %p4091_p11 = pnand %p4090_p10, %p4084_p3 }
  0x56   : > { %4094 = shalt.err (!%p4091_p11)
}
  0x57   : > { %3940 = dma.hbm_to_vmem [thread:$0]  (%p4369_p13), %s3831_s6, 128, %s207_s12, %s192_s7  }
  0x58 PF: > { %p3918_p12 = scmp.ge.s32.totalorder %s4222_s22, 1  ;;  %p211_p8 = scmp.lt.s32.totalorder %s4222_s22, 7 }
  0x5a   : > { %p212_p9 = pnand %p3918_p12, %p211_p8 }
  0x5c   : > { %215 = sbr.rel (%p212_p9) target bundleno = 849 (0x351), region = 32 }
  0x61   : > { %s4420_s4 = sand.u32 1, %s4198_s16  }
  0x62   : > { %s3919_s0 = sshll.u32 %s4420_s4, 6  ;;  %s218_s15 = scalar_lea.sflag [#allocation3], %s4420_s4 }
  0x63   : > { %s4424_s26 = scalar_lea.vmem [#allocation2], %s3919_s0 }
  0x64   : > { %4167 = dma.done.wait (%p4346_p7), %s218_s15, 1024  }
  0x65   : > { %4169 = vsyncadd (%p4346_p7), %s218_s15, 4294966272  ;;  %s226_s25 = sand.u32 1, %s4186_s13  }
  0x66   : > { %s3920_s3 = sshll.u32 %s226_s25, 3  ;;  %s227_s9 = scalar_lea.sflag [#allocation6], %s226_s25 }
  0x67   : > { %s230_s10 = scalar_lea.vmem [#allocation5], %s3920_s3 }
  0x68   : > { %4171 = dma.done.wait (%p4375_p0), %s227_s9, 128  }
  0x69   : > { %4173 = vsyncadd (%p4375_p0), %s227_s9, 4294967168  ;;  %v279_v0 = vlaneseq  ;;  %v6118_v2 = vmov 0.0   ;;  %v271_v3 = vld [vmem:[%s4424_s26 + $0x8] sm:$0xff]  ;;  %v270_v4 = vld [vmem:[%s4424_s26] sm:$0xff]  ;;  %s4227_s5 = smov 127   ;;  %vm337_vm1 = vcmask 130048  }
  0x6a   : > { %430 = vmatprep.mubr.f32.mxu0 %v6118_v2  ;;  %603 = vmatprep.mubr.f32.mxu1 %v6118_v2  ;;  %v278_v5 = vld [vmem:[%s230_s10] sm:$0xff]  ;;  %v4443_v7 = vld [vmem:[%s4424_s26 + $0x10] sm:$0xff]  ;;  %v4446_v8 = vld [vmem:[%s4424_s26 + $0x18] sm:$0xff]  ;;  %v4482_v23 = vand.u32 4294901760, %v271_v3  ;;  %v4484_v24 = vand.u32 4294901760, %v270_v4  ;;  %s3923_s28 = sshll.u32 (%p4382_p4), %s4206_s18, 3 }
  0x6b   : > { %v4435_v1 = vand.u32 127, %v279_v0  ;;  %306 = vrot.lane.b32.xlu0 %v271_v3, %s4227_s5  ;;  %v4451_v9 = vld [vmem:[%s4424_s26 + $0x20] sm:$0xff]  ;;  %v4454_v10 = vld [vmem:[%s4424_s26 + $0x28] sm:$0xff]  ;;  %v277_v11 = vld [vmem:[%s4424_s26 + $0x38] sm:$0xff]  ;;  %s3771_s11 = ssub.s32 (%p4382_p4), 17, %s3923_s28 }
  0x6c   : > { %v276_v12 = vld [vmem:[%s4424_s26 + $0x30] sm:$0xff]  ;;  %v329_v13 = vld [vmem:[%s6098_s2] sm:$0xff]  ;;  %v330_v15 = vld [vmem:[%s6098_s2 + $0x8] sm:$0xff]  ;;  %v4500_v32 = vsub.f32 %v270_v4, %v4484_v24  ;;  %v4505_v34 = vsub.f32 %v271_v3, %v4482_v23  ;;  %p3772_p7 = scmp.lt.s32.totalorder (%p4382_p4), %s3771_s11, 8 }
  0x6d   : > { %vm288_vm0 = vcmp.lt.s32.totalorder %v4435_v1, 1  ;;  %v339_v14 = vsel %vm337_vm1, %v329_v13, 0  ;;  %v342_v17 = vsel %vm337_vm1, %v330_v15, 0  ;;  %v331_v18 = vld [vmem:[%s6098_s2 + $0x10] sm:$0xff]  ;;  %v332_v22 = vld [vmem:[%s6098_s2 + $0x18] sm:$0xff]  ;;  %vm320_vm2 = vcmp.lt.s32.totalorder %v4435_v1, 127 }
  0x6e   : > { %v296_v6 = vsel %vm288_vm0, %v278_v5, %v270_v4  ;;  %v4467_v16 = vand.u32 4294901760, %v339_v14  ;;  %v4476_v20 = vand.u32 4294901760, %v342_v17  ;;  %v345_v21 = vsel %vm337_vm1, %v331_v18, 0  ;;  %v333_v31 = vld [vmem:[%s6098_s2 + $0x20] sm:$0xff]  ;;  %v334_v42 = vld [vmem:[%s6098_s2 + $0x28] sm:$0xff]  ;;  %v335_v62 = vld [vmem:[%s6098_s2 + $0x30] sm:$0xff] }
  0x6f   : > { %304 = vrot.lane.b32.xlu1 %v296_v6, %s4227_s5  ;;  %308 = vrot.lane.b32.xlu0 %v4443_v7, %s4227_s5  ;;  %v4493_v28 = vand.u32 4294901760, %v345_v21  ;;  %v348_v29 = vsel %vm337_vm1, %v332_v22, 0  ;;  %v351_v41 = vsel %vm337_vm1, %v333_v31, 0  ;;  %v561_v48 = vand.u32 4294901760, %v4505_v34  ;;  %v336_v22 = vld [vmem:[%s6098_s2 + $0x38] sm:$0xff] }
  0x70   : > { %v4474_v19 = vsub.f32 %v339_v14, %v4467_v16  ;;  %v4491_v27 = vsub.f32 %v342_v17, %v4476_v20  ;;  %v4509_v36 = vand.u32 4294901760, %v348_v29  ;;  %v567_v49 = vand.u32 4294901760, %v4500_v32 }
  0x71   : > { %v4517_v40 = vsub.f32 %v345_v21, %v4493_v28  ;;  %v4543_v52 = vand.u32 4294901760, %v351_v41  ;;  %v354_v53 = vsel %vm337_vm1, %v334_v42, 0  ;;  %v562_v61 = vsub.f32 %v4505_v34, %v561_v48 }
  0x72   : > { %6174 = vst [vmem:[#allocation18_spill] sm:$0xff] %v4474_v19  ;;  %v4488_v26 = vand.u32 4294901760, %v4474_v19  ;;  %6176 = vst [vmem:[#allocation20_spill] sm:$0xff] %v4491_v27  ;;  %v4514_v39 = vand.u32 4294901760, %v4491_v27  ;;  %v4541_v51 = vsub.f32 %v348_v29, %v4509_v36  ;;  %v568_v3 = vsub.f32 %v4500_v32, %v567_v49 }
  0x73   : > { %310 = vrot.lane.b32.xlu1 %v4446_v8, %s4227_s5  ;;  %312 = vrot.lane.b32.xlu0 %v4451_v9, %s4227_s5  ;;  %6178 = vst [vmem:[#allocation22_spill] sm:$0xff] %v4517_v40  ;;  %v4553_v57 = vand.u32 4294901760, %v4517_v40  ;;  %v4583_v5 = vand.u32 4294901760, %v354_v53  ;;  %v4591_v13 = vsub.f32 %v351_v41, %v4543_v52  ;;  %v357_v15 = vsel %vm337_vm1, %v335_v62, 0 }
  0x74   : > { %6175 = vst [vmem:[#allocation19_spill] sm:$0xff] %v4488_v26  ;;  %v434_v38 = vsub.f32 %v4474_v19, %v4488_v26  ;;  %6177 = vst [vmem:[#allocation21_spill] sm:$0xff] %v4514_v39  ;;  %v445_v56 = vsub.f32 %v4491_v27, %v4514_v39  ;;  %v4581_v4 = vand.u32 4294901760, %v4541_v51  ;;  %v563_v21 = vand.u32 4294901760, %v562_v61 }
  0x75   : > { %6179 = vst [vmem:[#allocation23_spill] sm:$0xff] %v4541_v51  ;;  %6181 = vst [vmem:[#allocation25_spill] sm:$0xff] %v4553_v57  ;;  %v569_v29 = vand.u32 4294901760, %v568_v3  ;;  %v4609_v31 = vsub.f32 %v354_v53, %v4583_v5  ;;  %v360_v41 = vsel %vm337_vm1, %v336_v22, 0 }
  0x76   : > { %v4548_v55 = vand.u32 4294901760, %v434_v38  ;;  %6182 = vst [vmem:[#allocation26_spill] sm:$0xff] %v4581_v4  ;;  %v4586_v6 = vand.u32 4294901760, %v445_v56  ;;  %6184 = vst [vmem:[#allocation28_spill] sm:$0xff] %v4591_v13  ;;  %v4619_v38 = vand.u32 4294901760, %v357_v15  ;;  %v4635_v56 = vand.u32 4294901760, %v360_v41 }
  0x77   : > { %314 = vrot.lane.b32.xlu1 %v4454_v10, %s4227_s5  ;;  %316 = vrot.lane.b32.xlu0 %v276_v12, %s4227_s5  ;;  %v456_v12 = vsub.f32 %v4517_v40, %v4553_v57  ;;  %6185 = vst [vmem:[#allocation29_spill] sm:$0xff] %v4609_v31  ;;  %v4624_v42 = vand.u32 4294901760, %v4609_v31 }
  0x78   : > { %6180 = vst [vmem:[#allocation24_spill] sm:$0xff] %v4548_v55  ;;  %6183 = vst [vmem:[#allocation27_spill] sm:$0xff] %v4586_v6 }
  0x79   : > { %6188 = vst [vmem:[#allocation32_spill] sm:$0xff] %v4619_v38  ;;  %6189 = vst [vmem:[#allocation33_spill] sm:$0xff] %v4624_v42  ;;  %v489_v61 = vsub.f32 %v4609_v31, %v4624_v42 }
  0x7a   : > { %6192 = vst [vmem:[#allocation36_spill] sm:$0xff] %v4635_v56 }
  0x7b   : > { %318 = vrot.lane.b32.xlu1 %v277_v11, %s4227_s5  ;;  %v4659_v3 = vand.u32 4294901760, %v489_v61  ;;  %s3763_s5 = scalar_lea.sflag [#allocation4], %s4420_s4 }
  0x7d   : > { %6196 = vst [vmem:[#allocation40_spill] sm:$0xff] %v4659_v3 }
  0xdd   : > { %v307_v25 = vpop.permute.xlu0 %306 }
  0xe1   : > { %v305_v30 = vpop.permute.xlu1 %304  ;;  %v309_v37 = vpop.permute.xlu0 %308 }
  0xe2   : > { %v327_v33 = vsel %vm320_vm2, %v305_v30, %v307_v25  ;;  %v326_v44 = vsel %vm320_vm2, %v307_v25, %v309_v37 }
  0xe3   : > { %v4507_v35 = vand.u32 4294901760, %v327_v33  ;;  %v4530_v46 = vand.u32 4294901760, %v326_v44 }
  0xe5   : > { %v4524_v43 = vsub.f32 %v327_v33, %v4507_v35  ;;  %v4528_v45 = vpop.permute.xlu1 %310  ;;  %v548_v54 = vsub.f32 %v326_v44, %v4530_v46  ;;  %391 = vmatprep.subr.mxu0 %v4530_v46  ;;  %v4558_v59 = vpop.permute.xlu0 %312  ;;  %v467_v33 = vsub.f32 %v4541_v51, %v4581_v4 }
  0xe6   : > { %v4535_v47 = vsel %vm320_vm2, %v309_v37, %v4528_v45  ;;  %393 = vmatpush1.msra.mxu0 %v4507_v35  ;;  %v4617_v37 = vand.u32 4294901760, %v4591_v13 }
  0xe7   : > { %v555_v50 = vand.u32 4294901760, %v4524_v43  ;;  %395 = vmatprep.subr.mxu0 %v4482_v23  ;;  %v549_v60 = vand.u32 4294901760, %v548_v54  ;;  %v4628_v44 = vand.u32 4294901760, %v467_v33 }
  0xe8   : > { %397 = vmatpush1.msra.mxu0 %v4484_v24  ;;  %6187 = vst [vmem:[#allocation31_spill] sm:$0xff] %v4617_v37  ;;  %v478_v53 = vsub.f32 %v4591_v13, %v4617_v37 }
  0xe9   : > { %v4556_v58 = vpop.permute.xlu1 %314  ;;  %v556_v0 = vsub.f32 %v4524_v43, %v555_v50  ;;  %436 = vmatmul.mubr.f32.vlgmr.msra.gmra.mxu0 %v4548_v55  ;;  %690 = vmatprep.subr.mxu0 %v548_v54  ;;  %v550_v11 = vsub.f32 %v548_v54, %v549_v60  ;;  %6190 = vst [vmem:[#allocation34_spill] sm:$0xff] %v4628_v44  ;;  %v4684_v22 = vpop.permute.xlu0 %316 }
  0xea   : > { %v4571_v63 = vsel %vm320_vm2, %v4558_v59, %v4556_v58  ;;  %693 = vmatpush1.msra.mxu0 %v4524_v43  ;;  %441 = vmatprep.mubr.f32.mxu0 %v6118_v2  ;;  %v4633_v54 = vsub.f32 %v357_v15, %v4619_v38 }
  0xeb   : > { %696 = vmatprep.subr.mxu0 %v4505_v34  ;;  %v551_v18 = vand.u32 4294901760, %v550_v11  ;;  %v557_v25 = vand.u32 4294901760, %v556_v0  ;;  %v4652_v0 = vsub.f32 %v360_v41, %v4635_v56 }
  0xec   : > { %699 = vmatpush1.msra.mxu0 %v4500_v32  ;;  %6191 = vst [vmem:[#allocation35_spill] sm:$0xff] %v4633_v54  ;;  %v4649_v62 = vand.u32 4294901760, %v4633_v54  ;;  %v4749_v32 = vand.u32 4294901760, %v4535_v47 }
  0xed   : > { %v4594_v14 = vpop.permute.xlu1 %318  ;;  %447 = vmatmul.mubr.f32.gmra.mxu0 %v4586_v6  ;;  %552 = vmatprep.subr.mxu1 %v551_v18  ;;  %6195 = vst [vmem:[#allocation39_spill] sm:$0xff] %v4652_v0  ;;  %v324_v18 = vsel %vm320_vm2, %v4528_v45, %v4558_v59 }
  0xee   : > { %v4601_v17 = vsel %vm320_vm2, %v4594_v14, %v305_v30  ;;  %v4612_v30 = vand.u32 4294901760, %v456_v12  ;;  %969 = vmatprep.subr.mxu0 %v549_v60  ;;  %558 = vmatpush1.msra.mxu1 %v557_v25  ;;  %v4644_v60 = vand.u32 4294901760, %v478_v53  ;;  %6194 = vst [vmem:[#allocation38_spill] sm:$0xff] %v4649_v62  ;;  %v500_v11 = vsub.f32 %v4633_v54, %v4649_v62 }
  0xef   : > { %564 = vmatprep.subr.mxu1 %v563_v21  ;;  %452 = vmatprep.mubr.f32.mxu0 %v6118_v2  ;;  %v4664_v12 = vand.u32 4294901760, %v4652_v0  ;;  %v4692_v25 = vsel %vm320_vm2, %v4684_v22, %v4594_v14 }
  0xf0   : > { %6186 = vst [vmem:[#allocation30_spill] sm:$0xff] %v4612_v30  ;;  %570 = vmatpush1.msra.mxu1 %v569_v29  ;;  %6193 = vst [vmem:[#allocation37_spill] sm:$0xff] %v4644_v60  ;;  %v4695_v29 = vand.u32 4294901760, %v324_v18 }
  0xf1   : > { %458 = vmatmul.mubr.f32.gmra.mxu0 %v4612_v30  ;;  %605 = vmatmul.mubr.f32.vlgmr.msra.gmra.mxu1 %v4467_v16  ;;  %6197 = vst [vmem:[#allocation41_spill] sm:$0xff] %v4664_v12  ;;  %v511_v15 = vsub.f32 %v4652_v0, %v4664_v12 }
  0xf2   : > { %826 = vmatprep.subr.mxu1 %v4530_v46  ;;  %463 = vmatprep.mubr.f32.mxu0 %v6118_v2  ;;  %v4702_v45 = vsub.f32 %v324_v18, %v4695_v29 }
  0xf3   : > { %828 = vmatpush1.msra.mxu1 %v4507_v35  ;;  %610 = vmatprep.mubr.f32.mxu1 %v6118_v2  ;;  %v4682_v21 = vand.u32 4294901760, %v511_v15 }
  0xf4   : > { %830 = vmatprep.subr.mxu1 %v4482_v23  ;;  %v1383_v59 = vand.u32 4294901760, %v4702_v45 }
  0xf5   : > { %832 = vmatpush1.msra.mxu1 %v4484_v24  ;;  %469 = vmatmul.mubr.f32.gmra.mxu0 %v4628_v44  ;;  %6199 = vst [vmem:[#allocation43_spill] sm:$0xff] %v4682_v21 }
  0xf6   : > { %612 = vmatmul.mubr.f32.gmra.mxu1 %v4476_v20  ;;  %1100 = vmatprep.subr.mxu1 %v4530_v46  ;;  %v4670_v46 = vand.u32 4294901760, %v500_v11  ;;  %v1384_v43 = vsub.f32 %v4702_v45, %v1383_v59  ;;  %v322_v11 = vsel %vm320_vm2, %v4556_v58, %v4684_v22 }
  0xf7   : > { %474 = vmatprep.mubr.f32.mxu0 %v6118_v2  ;;  %617 = vmatprep.mubr.f32.mxu1 %v6118_v2  ;;  %v4861_v15 = vand.u32 4294901760, %v322_v11 }
  0xf8   : > { %6198 = vst [vmem:[#allocation42_spill] sm:$0xff] %v4670_v46  ;;  %v1385_v34 = vand.u32 4294901760, %v1384_v43 }
  0xf9   : > { %480 = vmatmul.mubr.f32.gmra.mxu0 %v4644_v60  ;;  %v4868_v1 = vsub.f32 %v322_v11, %v4861_v15 }
  0xfa   : > { %619 = vmatmul.mubr.f32.gmra.mxu1 %v4493_v28  ;;  %485 = vmatprep.mubr.f32.mxu0 %v6118_v2 }
  0xfb   : > { %624 = vmatprep.mubr.f32.mxu1 %v6118_v2  ;;  %v2217_v58 = vand.u32 4294901760, %v4868_v1 }
  0xfd   : > { %491 = vmatmul.mubr.f32.gmra.mxu0 %v4659_v3  ;;  %v2218_v18 = vsub.f32 %v4868_v1, %v2217_v58 }
  0xfe   : > { %626 = vmatmul.mubr.f32.gmra.mxu1 %v4509_v36  ;;  %496 = vmatprep.mubr.f32.mxu0 %v6118_v2 }
  0xff   : > { %631 = vmatprep.mubr.f32.mxu1 %v6118_v2  ;;  %v2219_v22 = vand.u32 4294901760, %v2218_v18 }
 0x101   : > { %502 = vmatmul.mubr.f32.gmra.mxu0 %v4670_v46 }
 0x102   : > { %633 = vmatmul.mubr.f32.gmra.mxu1 %v4543_v52  ;;  %507 = vmatprep.mubr.f32.mxu0 %v6118_v2 }
 0x103   : > { %638 = vmatprep.mubr.f32.mxu1 %v6118_v2 }
 0x105   : > { %513 = vmatmul.mubr.f32.gmra.mxu0 %v4682_v21 }
 0x106   : > { %640 = vmatmul.mubr.f32.gmra.mxu1 %v4583_v5  ;;  %732 = vmatprep.mubr.f32.mxu0 %v6118_v2 }
 0x107   : > { %645 = vmatprep.mubr.f32.mxu1 %v6118_v2 }
 0x109   : > { %735 = vmatmul.mubr.f32.vlgmr.msra.gmra.mxu0 %v4474_v19 }
 0x10a   : > { %647 = vmatmul.mubr.f32.gmra.mxu1 %v4619_v38  ;;  %973 = vmatpush1.msra.mxu0 %v555_v50 }
 0x10b   : > { %652 = vmatprep.mubr.f32.mxu1 %v6118_v2  ;;  %740 = vmatprep.mubr.f32.mxu0 %v6118_v2 }
 0x10c   : > { %977 = vmatprep.subr.mxu0 %v561_v48 }
 0x10d   : > { %743 = vmatmul.mubr.f32.gmra.mxu0 %v4491_v27 }
 0x10e   : > { %654 = vmatmul.mubr.f32.gmra.mxu1 %v4635_v56  ;;  %748 = vmatprep.mubr.f32.mxu0 %v6118_v2 }
 0x10f   : > { %865 = vmatprep.mubr.f32.mxu1 %v6118_v2  ;;  %981 = vmatpush1.msra.mxu0 %v567_v49  ;;  %v4765_v49 = vsub.f32 %v4535_v47, %v4749_v32 }
 0x110   : > { %1225 = vmatprep.subr.mxu0 %v4695_v29 }
 0x111   : > { %751 = vmatmul.mubr.f32.gmra.mxu0 %v4517_v40  ;;  %v1389_v14 = vand.u32 4294901760, %v4765_v49 }
 0x112   : > { %869 = vmatmul.mubr.f32.vlgmr.msra.gmra.mxu1 %v4488_v26  ;;  %756 = vmatprep.mubr.f32.mxu0 %v6118_v2 }
 0x113   : > { %1102 = vmatpush1.msra.mxu1 %v4507_v35  ;;  %874 = vmatprep.mubr.f32.mxu1 %v6118_v2  ;;  %v1390_v47 = vsub.f32 %v4765_v49, %v1389_v14 }
 0x114   : > { %1104 = vmatprep.subr.mxu1 %v4482_v23  ;;  %v4743_v23 = vand.u32 4294901760, %v4446_v8 }
 0x115   : > { %759 = vmatmul.mubr.f32.gmra.mxu0 %v4541_v51  ;;  %1106 = vmatpush1.msra.mxu1 %v4484_v24  ;;  %v4746_v24 = vand.u32 4294901760, %v4443_v7  ;;  %v1391_v53 = vand.u32 4294901760, %v1390_v47 }
 0x116   : > { %878 = vmatmul.mubr.f32.gmra.mxu1 %v4514_v39  ;;  %764 = vmatprep.mubr.f32.mxu0 %v6118_v2  ;;  %v4757_v35 = vsub.f32 %v4446_v8, %v4743_v23 }
 0x117   : > { %883 = vmatprep.mubr.f32.mxu1 %v6118_v2  ;;  %1386 = vmatprep.subr.mxu1 %v1385_v34  ;;  %v4761_v48 = vsub.f32 %v4443_v7, %v4746_v24 }
 0x118   : > { %v1395_v50 = vand.u32 4294901760, %v4757_v35 }
 0x119   : > { %767 = vmatmul.mubr.f32.gmra.mxu0 %v4591_v13  ;;  %v1401_v8 = vand.u32 4294901760, %v4761_v48 }
 0x11a   : > { %887 = vmatmul.mubr.f32.gmra.mxu1 %v4553_v57  ;;  %772 = vmatprep.mubr.f32.mxu0 %v6118_v2  ;;  %v1396_v7 = vsub.f32 %v4757_v35, %v1395_v50 }
 0x11b   : > { %892 = vmatprep.mubr.f32.mxu1 %v6118_v2  ;;  %v1402_v33 = vsub.f32 %v4761_v48, %v1401_v8 }
 0x11c   : > { %v1397_v41 = vand.u32 4294901760, %v1396_v7 }
 0x11d   : > { %775 = vmatmul.mubr.f32.gmra.mxu0 %v4609_v31  ;;  %v1403_v61 = vand.u32 4294901760, %v1402_v33 }
 0x11e   : > { %896 = vmatmul.mubr.f32.gmra.mxu1 %v4581_v4  ;;  %780 = vmatprep.mubr.f32.mxu0 %v6118_v2 }
 0x11f   : > { %901 = vmatprep.mubr.f32.mxu1 %v6118_v2 }
 0x121   : > { %783 = vmatmul.mubr.f32.gmra.mxu0 %v4633_v54 }
 0x122   : > { %905 = vmatmul.mubr.f32.gmra.mxu1 %v4617_v37  ;;  %788 = vmatprep.mubr.f32.mxu0 %v6118_v2 }
 0x123   : > { %910 = vmatprep.mubr.f32.mxu1 %v6118_v2 }
 0x125   : > { %791 = vmatmul.mubr.f32.gmra.mxu0 %v4652_v0 }
 0x126   : > { %914 = vmatmul.mubr.f32.gmra.mxu1 %v4624_v42  ;;  %1014 = vmatprep.mubr.f32.mxu0 %v6118_v2 }
 0x127   : > { %919 = vmatprep.mubr.f32.mxu1 %v6118_v2 }
 0x129   : > { %1016 = vmatmul.mubr.f32.vlgmr.msra.gmra.mxu0 %v4467_v16 }
 0x12a   : > { %923 = vmatmul.mubr.f32.gmra.mxu1 %v4649_v62  ;;  %1227 = vmatpush1.msra.mxu0 %v4749_v32 }
 0x12b   : > { %1229 = vmatprep.subr.mxu0 %v4743_v23  ;;  %928 = vmatprep.mubr.f32.mxu1 %v6118_v2 }
 0x12c   : > { %1231 = vmatpush1.msra.mxu0 %v4746_v24  ;;  %1021 = vmatprep.mubr.f32.mxu0 %v6118_v2 }
 0x12d   : > { %1524 = vmatprep.subr.mxu0 %v4702_v45  ;;  %1023 = vmatmul.mubr.f32.gmra.mxu0 %v4476_v20  ;;  %v4912_v45 = vand.u32 4294901760, %v4451_v9 }
 0x12e   : > { %932 = vmatmul.mubr.f32.gmra.mxu1 %v4664_v12  ;;  %1028 = vmatprep.mubr.f32.mxu0 %v6118_v2 }
 0x12f   : > { %1139 = vmatprep.mubr.f32.mxu1 %v6118_v2  ;;  %v4927_v34 = vsub.f32 %v4451_v9, %v4912_v45 }
 0x131   : > { %1030 = vmatmul.mubr.f32.gmra.mxu0 %v4493_v28 }
 0x132   : > { %1141 = vmatmul.mubr.f32.vlgmr.msra.gmra.mxu1 %v4467_v16  ;;  %1035 = vmatprep.mubr.f32.mxu0 %v6118_v2 }
 0x133   : > { %1392 = vmatpush1.msra.mxu1 %v1391_v53  ;;  %1146 = vmatprep.mubr.f32.mxu1 %v6118_v2 }
 0x134   : > { %1398 = vmatprep.subr.mxu1 %v1397_v41 }
 0x135   : > { %1404 = vmatpush1.msra.mxu1 %v1403_v61  ;;  %1037 = vmatmul.mubr.f32.gmra.mxu0 %v4509_v36 }
 0x136   : > { %1660 = vmatprep.subr.mxu1 %v4695_v29  ;;  %1148 = vmatmul.mubr.f32.gmra.mxu1 %v4476_v20 }
 0x137   : > { %1042 = vmatprep.mubr.f32.mxu0 %v6118_v2  ;;  %1153 = vmatprep.mubr.f32.mxu1 %v6118_v2 }
 0x139   : > { %1044 = vmatmul.mubr.f32.gmra.mxu0 %v4543_v52 }
 0x13a   : > { %1155 = vmatmul.mubr.f32.gmra.mxu1 %v4493_v28  ;;  %1049 = vmatprep.mubr.f32.mxu0 %v6118_v2 }
 0x13b   : > { %1160 = vmatprep.mubr.f32.mxu1 %v6118_v2 }
 0x13d   : > { %1051 = vmatmul.mubr.f32.gmra.mxu0 %v4583_v5 }
 0x13e   : > { %1162 = vmatmul.mubr.f32.gmra.mxu1 %v4509_v36  ;;  %1056 = vmatprep.mubr.f32.mxu0 %v6118_v2 }
 0x13f   : > { %1167 = vmatprep.mubr.f32.mxu1 %v6118_v2 }
 0x141   : > { %1058 = vmatmul.mubr.f32.gmra.mxu0 %v4619_v38 }
 0x142   : > { %1169 = vmatmul.mubr.f32.gmra.mxu1 %v4543_v52  ;;  %1063 = vmatprep.mubr.f32.mxu0 %v6118_v2 }
 0x143   : > { %1174 = vmatprep.mubr.f32.mxu1 %v6118_v2 }
 0x145   : > { %1065 = vmatmul.mubr.f32.gmra.mxu0 %v4635_v56 }
 0x146   : > { %1176 = vmatmul.mubr.f32.gmra.mxu1 %v4583_v5  ;;  %1264 = vmatprep.mubr.f32.mxu0 %v6118_v2 }
 0x147   : > { %1181 = vmatprep.mubr.f32.mxu1 %v6118_v2 }
 0x149   : > { %1270 = vmatmul.mubr.f32.vlgmr.msra.gmra.mxu0 %v4548_v55 }
 0x14a   : > { %1183 = vmatmul.mubr.f32.gmra.mxu1 %v4619_v38  ;;  %1527 = vmatpush1.msra.mxu0 %v4765_v49 }
 0x14b   : > { %1530 = vmatprep.subr.mxu0 %v4757_v35  ;;  %1188 = vmatprep.mubr.f32.mxu1 %v6118_v2 }
 0x14c   : > { %1533 = vmatpush1.msra.mxu0 %v4761_v48  ;;  %1275 = vmatprep.mubr.f32.mxu0 %v6118_v2 }
 0x14d   : > { %1803 = vmatprep.subr.mxu0 %v1383_v59  ;;  %1281 = vmatmul.mubr.f32.gmra.mxu0 %v4586_v6  ;;  %v4915_v59 = vand.u32 4294901760, %v4571_v63 }
 0x14e   : > { %1190 = vmatmul.mubr.f32.gmra.mxu1 %v4635_v56  ;;  %1286 = vmatprep.mubr.f32.mxu0 %v6118_v2 }
 0x14f   : > { %1437 = vmatprep.mubr.f32.mxu1 %v6118_v2 }
 0x151   : > { %1292 = vmatmul.mubr.f32.gmra.mxu0 %v4612_v30 }
 0x152   : > { %1439 = vmatmul.mubr.f32.vlgmr.msra.gmra.mxu1 %v4467_v16  ;;  %1297 = vmatprep.mubr.f32.mxu0 %v6118_v2 }
 0x153   : > { %1662 = vmatpush1.msra.mxu1 %v4749_v32  ;;  %1444 = vmatprep.mubr.f32.mxu1 %v6118_v2 }
 0x154   : > { %1664 = vmatprep.subr.mxu1 %v4743_v23 }
 0x155   : > { %1666 = vmatpush1.msra.mxu1 %v4746_v24  ;;  %1303 = vmatmul.mubr.f32.gmra.mxu0 %v4628_v44 }
 0x156   : > { %1934 = vmatprep.subr.mxu1 %v4695_v29  ;;  %1446 = vmatmul.mubr.f32.gmra.mxu1 %v4476_v20  ;;  %v4909_v29 = vand.u32 4294901760, %v4454_v10 }
 0x157   : > { %1308 = vmatprep.mubr.f32.mxu0 %v6118_v2  ;;  %1451 = vmatprep.mubr.f32.mxu1 %v6118_v2 }
 0x158   : > { %v4923_v43 = vsub.f32 %v4454_v10, %v4909_v29  ;;  %v6107_v10 = vand.u32 4294901760, %v4927_v34 }
 0x159   : > { %1314 = vmatmul.mubr.f32.gmra.mxu0 %v4644_v60 }
 0x15a   : > { %1453 = vmatmul.mubr.f32.gmra.mxu1 %v4493_v28  ;;  %1319 = vmatprep.mubr.f32.mxu0 %v6118_v2  ;;  %v2236_v35 = vsub.f32 %v4927_v34, %v6107_v10 }
 0x15b   : > { %1458 = vmatprep.mubr.f32.mxu1 %v6118_v2 }
 0x15d   : > { %1325 = vmatmul.mubr.f32.gmra.mxu0 %v4659_v3 }
 0x15e   : > { %1460 = vmatmul.mubr.f32.gmra.mxu1 %v4509_v36  ;;  %1330 = vmatprep.mubr.f32.mxu0 %v6118_v2 }
 0x15f   : > { %1465 = vmatprep.mubr.f32.mxu1 %v6118_v2 }
 0x161   : > { %1336 = vmatmul.mubr.f32.gmra.mxu0 %v4670_v46 }
 0x162   : > { %1467 = vmatmul.mubr.f32.gmra.mxu1 %v4543_v52  ;;  %1341 = vmatprep.mubr.f32.mxu0 %v6118_v2 }
 0x163   : > { %1472 = vmatprep.mubr.f32.mxu1 %v6118_v2 }
 0x165   : > { %1347 = vmatmul.mubr.f32.gmra.mxu0 %v4682_v21 }
 0x166   : > { %1474 = vmatmul.mubr.f32.gmra.mxu1 %v4583_v5  ;;  %1566 = vmatprep.mubr.f32.mxu0 %v6118_v2 }
 0x167   : > { %1479 = vmatprep.mubr.f32.mxu1 %v6118_v2 }
 0x169   : > { %1569 = vmatmul.mubr.f32.vlgmr.msra.gmra.mxu0 %v4474_v19 }
 0x16a   : > { %1481 = vmatmul.mubr.f32.gmra.mxu1 %v4619_v38  ;;  %1807 = vmatpush1.msra.mxu0 %v1389_v14 }
 0x16b   : > { %1486 = vmatprep.mubr.f32.mxu1 %v6118_v2  ;;  %1574 = vmatprep.mubr.f32.mxu0 %v6118_v2 }
 0x16c   : > { %1811 = vmatprep.subr.mxu0 %v1395_v50  ;;  %v2237_v50 = vand.u32 4294901760, %v2236_v35 }
 0x16d   : > { %1577 = vmatmul.mubr.f32.gmra.mxu0 %v4491_v27 }
 0x16e   : > { %1488 = vmatmul.mubr.f32.gmra.mxu1 %v4635_v56  ;;  %1582 = vmatprep.mubr.f32.mxu0 %v6118_v2 }
 0x16f   : > { %1699 = vmatprep.mubr.f32.mxu1 %v6118_v2  ;;  %1815 = vmatpush1.msra.mxu0 %v1401_v8 }
 0x170   : > { %2059 = vmatprep.subr.mxu0 %v4861_v15 }
 0x171   : > { %1585 = vmatmul.mubr.f32.gmra.mxu0 %v4517_v40 }
 0x172   : > { %1703 = vmatmul.mubr.f32.vlgmr.msra.gmra.mxu1 %v4488_v26  ;;  %1590 = vmatprep.mubr.f32.mxu0 %v6118_v2 }
 0x173   : > { %1936 = vmatpush1.msra.mxu1 %v4749_v32  ;;  %1708 = vmatprep.mubr.f32.mxu1 %v6118_v2 }
 0x174   : > { %1938 = vmatprep.subr.mxu1 %v4743_v23  ;;  %v4931_v23 = vsub.f32 %v4571_v63, %v4915_v59 }
 0x175   : > { %1593 = vmatmul.mubr.f32.gmra.mxu0 %v4541_v51  ;;  %1940 = vmatpush1.msra.mxu1 %v4746_v24  ;;  %v6108_v24 = vand.u32 4294901760, %v4923_v43 }
 0x176   : > { %1712 = vmatmul.mubr.f32.gmra.mxu1 %v4514_v39  ;;  %1598 = vmatprep.mubr.f32.mxu0 %v6118_v2  ;;  %v6109_v32 = vand.u32 4294901760, %v4931_v23 }
 0x177   : > { %1717 = vmatprep.mubr.f32.mxu1 %v6118_v2  ;;  %2220 = vmatprep.subr.mxu1 %v2219_v22  ;;  %v2230_v9 = vsub.f32 %v4923_v43, %v6108_v24 }
 0x178   : > { %v2224_v63 = vsub.f32 %v4931_v23, %v6109_v32 }
 0x179   : > { %1601 = vmatmul.mubr.f32.gmra.mxu0 %v4591_v13  ;;  %v2231_v48 = vand.u32 4294901760, %v2230_v9 }
 0x17a   : > { %1721 = vmatmul.mubr.f32.gmra.mxu1 %v4553_v57  ;;  %1606 = vmatprep.mubr.f32.mxu0 %v6118_v2  ;;  %v2225_v49 = vand.u32 4294901760, %v2224_v63 }
 0x17b   : > { %1726 = vmatprep.mubr.f32.mxu1 %v6118_v2 }
 0x17d   : > { %1609 = vmatmul.mubr.f32.gmra.mxu0 %v4609_v31 }
 0x17e   : > { %1730 = vmatmul.mubr.f32.gmra.mxu1 %v4581_v4  ;;  %1614 = vmatprep.mubr.f32.mxu0 %v6118_v2 }
 0x17f   : > { %1735 = vmatprep.mubr.f32.mxu1 %v6118_v2 }
 0x181   : > { %1617 = vmatmul.mubr.f32.gmra.mxu0 %v4633_v54 }
 0x182   : > { %1739 = vmatmul.mubr.f32.gmra.mxu1 %v4617_v37  ;;  %1622 = vmatprep.mubr.f32.mxu0 %v6118_v2 }
 0x183   : > { %1744 = vmatprep.mubr.f32.mxu1 %v6118_v2 }
 0x185   : > { %1625 = vmatmul.mubr.f32.gmra.mxu0 %v4652_v0 }
 0x186   : > { %1748 = vmatmul.mubr.f32.gmra.mxu1 %v4624_v42  ;;  %1848 = vmatprep.mubr.f32.mxu0 %v6118_v2 }
 0x187   : > { %1753 = vmatprep.mubr.f32.mxu1 %v6118_v2 }
 0x189   : > { %1850 = vmatmul.mubr.f32.vlgmr.msra.gmra.mxu0 %v4467_v16 }
 0x18a   : > { %1757 = vmatmul.mubr.f32.gmra.mxu1 %v4649_v62  ;;  %2061 = vmatpush1.msra.mxu0 %v4915_v59 }
 0x18b   : > { %2063 = vmatprep.subr.mxu0 %v4909_v29  ;;  %1762 = vmatprep.mubr.f32.mxu1 %v6118_v2 }
 0x18c   : > { %2065 = vmatpush1.msra.mxu0 %v4912_v45  ;;  %1855 = vmatprep.mubr.f32.mxu0 %v6118_v2 }
 0x18d   : > { %2358 = vmatprep.subr.mxu0 %v4868_v1  ;;  %1857 = vmatmul.mubr.f32.gmra.mxu0 %v4476_v20 }
 0x18e   : > { %1766 = vmatmul.mubr.f32.gmra.mxu1 %v4664_v12  ;;  %1862 = vmatprep.mubr.f32.mxu0 %v6118_v2 }
 0x18f   : > { %1973 = vmatprep.mubr.f32.mxu1 %v6118_v2 }
 0x191   : > { %1864 = vmatmul.mubr.f32.gmra.mxu0 %v4493_v28 }
 0x192   : > { %1975 = vmatmul.mubr.f32.vlgmr.msra.gmra.mxu1 %v4467_v16  ;;  %1869 = vmatprep.mubr.f32.mxu0 %v6118_v2 }
 0x193   : > { %2226 = vmatpush1.msra.mxu1 %v2225_v49  ;;  %1980 = vmatprep.mubr.f32.mxu1 %v6118_v2 }
 0x194   : > { %2232 = vmatprep.subr.mxu1 %v2231_v48 }
 0x195   : > { %2238 = vmatpush1.msra.mxu1 %v2237_v50  ;;  %1871 = vmatmul.mubr.f32.gmra.mxu0 %v4509_v36 }
 0x196   : > { %2494 = vmatprep.subr.mxu1 %v4861_v15  ;;  %1982 = vmatmul.mubr.f32.gmra.mxu1 %v4476_v20 }
 0x197   : > { %1876 = vmatprep.mubr.f32.mxu0 %v6118_v2  ;;  %1987 = vmatprep.mubr.f32.mxu1 %v6118_v2 }
 0x199   : > { %1878 = vmatmul.mubr.f32.gmra.mxu0 %v4543_v52 }
 0x19a   : > { %1989 = vmatmul.mubr.f32.gmra.mxu1 %v4493_v28  ;;  %1883 = vmatprep.mubr.f32.mxu0 %v6118_v2 }
 0x19b   : > { %1994 = vmatprep.mubr.f32.mxu1 %v6118_v2 }
 0x19d   : > { %1885 = vmatmul.mubr.f32.gmra.mxu0 %v4583_v5 }
 0x19e   : > { %1996 = vmatmul.mubr.f32.gmra.mxu1 %v4509_v36  ;;  %1890 = vmatprep.mubr.f32.mxu0 %v6118_v2 }
 0x19f   : > { %2001 = vmatprep.mubr.f32.mxu1 %v6118_v2 }
 0x1a1   : > { %1892 = vmatmul.mubr.f32.gmra.mxu0 %v4619_v38 }
 0x1a2   : > { %2003 = vmatmul.mubr.f32.gmra.mxu1 %v4543_v52  ;;  %1897 = vmatprep.mubr.f32.mxu0 %v6118_v2 }
 0x1a3   : > { %2008 = vmatprep.mubr.f32.mxu1 %v6118_v2 }
 0x1a5   : > { %1899 = vmatmul.mubr.f32.gmra.mxu0 %v4635_v56 }
 0x1a6   : > { %2010 = vmatmul.mubr.f32.gmra.mxu1 %v4583_v5  ;;  %2098 = vmatprep.mubr.f32.mxu0 %v6118_v2 }
 0x1a7   : > { %2015 = vmatprep.mubr.f32.mxu1 %v6118_v2 }
 0x1a9   : > { %v4986_v8 = vpop.f32.mrf.mxu0  ;;  %2104 = vmatmul.mubr.f32.vlgmr.msra.gmra.mxu0 %v4548_v55 }
 0x1aa   : > { %2017 = vmatmul.mubr.f32.gmra.mxu1 %v4619_v38  ;;  %2361 = vmatpush1.msra.mxu0 %v4931_v23 }
 0x1ab   : > { %2364 = vmatprep.subr.mxu0 %v4923_v43  ;;  %v4992_v14 = vpop.f32.mrf.mxu0  ;;  %2022 = vmatprep.mubr.f32.mxu1 %v6118_v2 }
 0x1ac   : > { %2367 = vmatpush1.msra.mxu0 %v4927_v34  ;;  %2109 = vmatprep.mubr.f32.mxu0 %v6118_v2 }
 0x1ad   : > { %2637 = vmatprep.subr.mxu0 %v2217_v58  ;;  %v4999_v7 = vpop.f32.mrf.mxu0  ;;  %2115 = vmatmul.mubr.f32.gmra.mxu0 %v4586_v6 }
 0x1ae   : > { %2024 = vmatmul.mubr.f32.gmra.mxu1 %v4635_v56  ;;  %2120 = vmatprep.mubr.f32.mxu0 %v6118_v2 }
 0x1af   : > { %v5004_v47 = vpop.f32.mrf.mxu0  ;;  %2271 = vmatprep.mubr.f32.mxu1 %v6118_v2 }
 0x1b1   : > { %v5007_v33 = vpop.f32.mrf.mxu0  ;;  %v5009_v41 = vpop.f32.mrf.mxu1  ;;  %2126 = vmatmul.mubr.f32.gmra.mxu0 %v4612_v30 }
 0x1b2   : > { %2273 = vmatmul.mubr.f32.vlgmr.msra.gmra.mxu1 %v4467_v16  ;;  %2131 = vmatprep.mubr.f32.mxu0 %v6118_v2 }
 0x1b3   : > { %2496 = vmatpush1.msra.mxu1 %v4915_v59  ;;  %v5015_v53 = vpop.f32.mrf.mxu0  ;;  %v5017_v61 = vpop.f32.mrf.mxu1  ;;  %2278 = vmatprep.mubr.f32.mxu1 %v6118_v2 }
 0x1b4   : > { %2498 = vmatprep.subr.mxu1 %v4909_v29 }
 0x1b5   : > { %2500 = vmatpush1.msra.mxu1 %v4912_v45  ;;  %v5022_v11 = vpop.f32.mrf.mxu0  ;;  %2137 = vmatmul.mubr.f32.gmra.mxu0 %v4628_v44 }
 0x1b6   : > { %2768 = vmatprep.subr.mxu1 %v4861_v15  ;;  %v5026_v1 = vpop.f32.mrf.mxu1  ;;  %2280 = vmatmul.mubr.f32.gmra.mxu1 %v4476_v20 }
 0x1b7   : > { %v5029_v58 = vpop.f32.mrf.mxu0  ;;  %2142 = vmatprep.mubr.f32.mxu0 %v6118_v2  ;;  %2285 = vmatprep.mubr.f32.mxu1 %v6118_v2 }
 0x1b8   : > { %v5033_v18 = vpop.f32.mrf.mxu1 }
 0x1b9   : > { %v5035_v22 = vpop.f32.mrf.mxu0  ;;  %2148 = vmatmul.mubr.f32.gmra.mxu0 %v4644_v60 }
 0x1ba   : > { %v5038_v9 = vpop.f32.mrf.mxu1  ;;  %2287 = vmatmul.mubr.f32.gmra.mxu1 %v4493_v28  ;;  %2153 = vmatprep.mubr.f32.mxu0 %v6118_v2 }
 0x1bb   : > { %v5042_v15 = vpop.f32.mrf.mxu0  ;;  %2292 = vmatprep.mubr.f32.mxu1 %v6118_v2 }
 0x1bc   : > { %v5045_v63 = vpop.f32.mrf.mxu1 }
 0x1bd   : > { %v5047_v35 = vpop.f32.mrf.mxu0  ;;  %2159 = vmatmul.mubr.f32.gmra.mxu0 %v4659_v3  ;;  %v5070_v3 = vand.u32 4294901760, %v4601_v17 }
 0x1be   : > { %v5050_v48 = vpop.f32.mrf.mxu1  ;;  %2294 = vmatmul.mubr.f32.gmra.mxu1 %v4509_v36  ;;  %2164 = vmatprep.mubr.f32.mxu0 %v6118_v2 }
 0x1bf   : > { %v5054_v49 = vpop.f32.mrf.mxu0  ;;  %2299 = vmatprep.mubr.f32.mxu1 %v6118_v2  ;;  %v5086_v6 = vsub.f32 %v4601_v17, %v5070_v3  ;;  %v6211_v17 = vmov 0.0  }
 0x1c0   : > { %6200 = vst [vmem:[#allocation44_spill] sm:$0xff] %v5054_v49  ;;  %v5057_v50 = vpop.f32.mrf.mxu1 }
 0x1c1   : > { %v5059_v10 = vpop.f32.mrf.mxu0  ;;  %2170 = vmatmul.mubr.f32.gmra.mxu0 %v4670_v46  ;;  %6206 = vst [vmem:[#allocation50_spill] sm:$0xff] %v5086_v6 }
 0x1c2   : > { %6201 = vst [vmem:[#allocation45_spill] sm:$0xff] %v5059_v10  ;;  %v5062_v24 = vpop.f32.mrf.mxu1  ;;  %2301 = vmatmul.mubr.f32.gmra.mxu1 %v4543_v52  ;;  %2175 = vmatprep.mubr.f32.mxu0 %v6118_v2 }
 0x1c3   : > { %v5066_v32 = vpop.f32.mrf.mxu0  ;;  %2306 = vmatprep.mubr.f32.mxu1 %v6118_v2 }
 0x1c4   : > { %6202 = vst [vmem:[#allocation46_spill] sm:$0xff] %v5066_v32  ;;  %v5072_v60 = vpop.f32.mrf.mxu1 }
 0x1c5   : > { %v5074_v44 = vpop.f32.mrf.mxu0  ;;  %2181 = vmatmul.mubr.f32.gmra.mxu0 %v4682_v21 }
 0x1c6   : > { %6203 = vst [vmem:[#allocation47_spill] sm:$0xff] %v5074_v44  ;;  %v5077_v46 = vpop.f32.mrf.mxu1  ;;  %2308 = vmatmul.mubr.f32.gmra.mxu1 %v4583_v5  ;;  %2400 = vmatprep.mubr.f32.mxu0 %v6118_v2  ;;  %v6209_v44 = vand.u32 4294901760, %v4931_v23 }
 0x1c7   : > { %6204 = vst [vmem:[#allocation48_spill] sm:$0xff] %v5077_v46  ;;  %v5081_v30 = vpop.f32.mrf.mxu0  ;;  %2313 = vmatprep.mubr.f32.mxu1 %v6118_v2 }
 0x1c8   : > { %6205 = vst [vmem:[#allocation49_spill] sm:$0xff] %v5081_v30  ;;  %v5088_v55 = vpop.f32.mrf.mxu1  ;;  %v6210_v30 = vand.u32 4294901760, %v4923_v43 }
 0x1c9   : > { %6207 = vst [vmem:[#allocation51_spill] sm:$0xff] %v5088_v55  ;;  %v5090_v32 = vpop.f32.mrf.mxu0  ;;  %2403 = vmatmul.mubr.f32.vlgmr.msra.gmra.mxu0 %v4474_v19  ;;  %v6213_v55 = vand.u32 4294901760, %v4927_v34  ;;  %v6122_v19 = vand.u32 4294901760, %v5086_v6 }
 0x1ca   : > { %v5093_v21 = vpop.f32.mrf.mxu1  ;;  %2315 = vmatmul.mubr.f32.gmra.mxu1 %v4619_v38  ;;  %2641 = vmatpush1.msra.mxu0 %v6209_v44 }
 0x1cb   : > { %6208 = vst [vmem:[#allocation52_spill] sm:$0xff] %v5093_v21  ;;  %2645 = vmatprep.subr.mxu0 %v6210_v30  ;;  %v5100_v2 = vpop.f32.mrf.mxu0  ;;  %2320 = vmatprep.mubr.f32.mxu1 %v6211_v17  ;;  %v3052_v43 = vsub.f32 %v5086_v6, %v6122_v19  ;;  %v5178_v21 = vand.u32 4294901760, %v4692_v25 }
 0x1cc   : > { %v5103_v10 = vpop.f32.mrf.mxu1  ;;  %2649 = vmatpush1.msra.mxu0 %v6213_v55  ;;  %2408 = vmatprep.mubr.f32.mxu0 %v6211_v17 }
 0x1cd   : > { %6212 = vst [vmem:[#allocation53_spill] sm:$0xff] %v5103_v10  ;;  %2893 = vmatprep.subr.mxu0 %v5070_v3  ;;  %v5110_v23 = vpop.f32.mrf.mxu0  ;;  %2411 = vmatmul.mubr.f32.gmra.mxu0 %v4491_v27  ;;  %v3053_v19 = vand.u32 4294901760, %v3052_v43  ;;  %6220 = vst [vmem:[#allocation60_spill] sm:$0xff] %v5178_v21  ;;  %v5200_v46 = vsub.f32 %v4692_v25, %v5178_v21 }
 0x1ce   : > { %v5113_v30 = vpop.f32.mrf.mxu1  ;;  %2322 = vmatmul.mubr.f32.gmra.mxu1 %v4635_v56  ;;  %2416 = vmatprep.mubr.f32.mxu0 %v6211_v17 }
 0x1cf   : > { %6214 = vst [vmem:[#allocation54_spill] sm:$0xff] %v5113_v30  ;;  %v5117_v44 = vpop.f32.mrf.mxu0  ;;  %2533 = vmatprep.mubr.f32.mxu1 %v6211_v17  ;;  %6226 = vst [vmem:[#allocation66_spill] sm:$0xff] %v5200_v46 }
 0x1d0   : > { %v5120_v55 = vpop.f32.mrf.mxu1 }
 0x1d1   : > { %6215 = vst [vmem:[#allocation55_spill] sm:$0xff] %v5120_v55  ;;  %v5125_v34 = vpop.f32.mrf.mxu0  ;;  %2419 = vmatmul.mubr.f32.gmra.mxu0 %v4517_v40 }
 0x1d2   : > { %v5128_v27 = vpop.f32.mrf.mxu1  ;;  %2537 = vmatmul.mubr.f32.vlgmr.msra.gmra.mxu1 %v4488_v26  ;;  %2424 = vmatprep.mubr.f32.mxu0 %v6211_v17 }
 0x1d3   : > { %2770 = vmatpush1.msra.mxu1 %v4915_v59  ;;  %v5133_v30 = vpop.f32.mrf.mxu0  ;;  %2542 = vmatprep.mubr.f32.mxu1 %v6211_v17 }
 0x1d4   : > { %2772 = vmatprep.subr.mxu1 %v4909_v29  ;;  %v5137_v55 = vpop.f32.mrf.mxu1 }
 0x1d5   : > { %2774 = vmatpush1.msra.mxu1 %v4912_v45  ;;  %v5140_v40 = vpop.f32.mrf.mxu0  ;;  %2427 = vmatmul.mubr.f32.gmra.mxu0 %v4541_v51 }
 0x1d6   : > { %3054 = vmatprep.subr.mxu1 %v3053_v19  ;;  %v5143_v26 = vpop.f32.mrf.mxu1  ;;  %2546 = vmatmul.mubr.f32.gmra.mxu1 %v4514_v39 }
 0x1d7   : > { %v5146_v59 = vpop.f32.mrf.mxu0  ;;  %2432 = vmatprep.mubr.f32.mxu0 %v6211_v17  ;;  %2551 = vmatprep.mubr.f32.mxu1 %v6211_v17 }
 0x1d8   : > { %v5150_v29 = vpop.f32.mrf.mxu1 }
 0x1d9   : > { %v5152_v43 = vpop.f32.mrf.mxu0  ;;  %2435 = vmatmul.mubr.f32.gmra.mxu0 %v4591_v13  ;;  %v4041_v13 = vld [vmem:[%s4424_s26 + $0x38] sm:$0xff] }
 0x1da   : > { %v5155_v45 = vpop.f32.mrf.mxu1  ;;  %2555 = vmatmul.mubr.f32.gmra.mxu1 %v4553_v57  ;;  %2440 = vmatprep.mubr.f32.mxu0 %v6211_v17  ;;  %v5175_v10 = vand.u32 4294901760, %v4041_v13 }
 0x1db   : > { %v5159_v19 = vpop.f32.mrf.mxu0  ;;  %2560 = vmatprep.mubr.f32.mxu1 %v6211_v17 }
 0x1dc   : > { %6216 = vst [vmem:[#allocation56_spill] sm:$0xff] %v5159_v19  ;;  %v5162_v39 = vpop.f32.mrf.mxu1  ;;  %6219 = vst [vmem:[#allocation59_spill] sm:$0xff] %v5175_v10  ;;  %v5196_v19 = vsub.f32 %v4041_v13, %v5175_v10 }
 0x1dd   : > { %v5164_v51 = vpop.f32.mrf.mxu0  ;;  %2443 = vmatmul.mubr.f32.gmra.mxu0 %v4609_v31 }
 0x1de   : > { %6217 = vst [vmem:[#allocation57_spill] sm:$0xff] %v5164_v51  ;;  %v5167_v56 = vpop.f32.mrf.mxu1  ;;  %2564 = vmatmul.mubr.f32.gmra.mxu1 %v4581_v4  ;;  %2448 = vmatprep.mubr.f32.mxu0 %v6211_v17  ;;  %v4042_v51 = vld [vmem:[%s4424_s26 + $0x30] sm:$0xff]  ;;  %6225 = vst [vmem:[#allocation65_spill] sm:$0xff] %v5196_v19  ;;  %s3921_s26 = sshll.u32 %s4420_s4, 9 }
 0x1df   : > { %v5171_v57 = vpop.f32.mrf.mxu0  ;;  %2569 = vmatprep.mubr.f32.mxu1 %v6211_v17  ;;  %v5183_v31 = vand.u32 4294901760, %v4042_v51  ;;  %s5277_s10 = scalar_lea.vmem [#allocation7], %s3921_s26 }
 0x1e0   : > { %6218 = vst [vmem:[#allocation58_spill] sm:$0xff] %v5171_v57  ;;  %v5180_v38 = vpop.f32.mrf.mxu1 }
 0x1e1   : > { %6221 = vst [vmem:[#allocation61_spill] sm:$0xff] %v5183_v31  ;;  %v5185_v49 = vpop.f32.mrf.mxu0  ;;  %2451 = vmatmul.mubr.f32.gmra.mxu0 %v4633_v54  ;;  %v5205_v54 = vsub.f32 %v4042_v51, %v5183_v31  ;;  %v6231_v51 = vand.u32 4294901760, %v5200_v46 }
 0x1e2   : > { %6222 = vst [vmem:[#allocation62_spill] sm:$0xff] %v5185_v49  ;;  %v5188_v4 = vpop.f32.mrf.mxu1  ;;  %2573 = vmatmul.mubr.f32.gmra.mxu1 %v4617_v37  ;;  %2456 = vmatprep.mubr.f32.mxu0 %v6211_v17 }
 0x1e3   : > { %6223 = vst [vmem:[#allocation63_spill] sm:$0xff] %v5188_v4  ;;  %v5192_v57 = vpop.f32.mrf.mxu0  ;;  %2578 = vmatprep.mubr.f32.mxu1 %v6211_v17  ;;  %6228 = vst [vmem:[#allocation68_spill] sm:$0xff] %v5205_v54 }
 0x1e4   : > { %6224 = vst [vmem:[#allocation64_spill] sm:$0xff] %v5192_v57  ;;  %v5202_v49 = vpop.f32.mrf.mxu1 }
 0x1e5   : > { %6227 = vst [vmem:[#allocation67_spill] sm:$0xff] %v5202_v49  ;;  %v5207_v4 = vpop.f32.mrf.mxu0  ;;  %2459 = vmatmul.mubr.f32.gmra.mxu0 %v4652_v0 }
 0x1e6   : > { %6229 = vst [vmem:[#allocation69_spill] sm:$0xff] %v5207_v4  ;;  %v5210_v37 = vpop.f32.mrf.mxu1  ;;  %2582 = vmatmul.mubr.f32.gmra.mxu1 %v4624_v42  ;;  %2682 = vmatprep.mubr.f32.mxu0 %v6211_v17  ;;  %v607_v42 = vadd.f32 %v5009_v41, %v4986_v8  ;;  %v3058_v4 = vsub.f32 %v5200_v46, %v6231_v51  ;;  %v6233_v51 = vand.u32 4294901760, %v5205_v54 }
 0x1e7   : > { %v5214_v13 = vpop.f32.mrf.mxu0  ;;  %2587 = vmatprep.mubr.f32.mxu1 %v6211_v17  ;;  %v609_v41 = vadd.f32 %v5017_v61, %v4992_v14  ;;  %v616_v61 = vadd.f32 %v5033_v18, %v5004_v47 }
 0x1e8   : > { %6230 = vst [vmem:[#allocation70_spill] sm:$0xff] %v5214_v13  ;;  %v5218_v57 = vpop.f32.mrf.mxu1 }
 0x1e9   : > { %v1017_v49 = vpop.f32.mrf.mxu0  ;;  %2684 = vmatmul.mubr.f32.vlgmr.msra.gmra.mxu0 %v4467_v16 }
 0x1ea   : > { %v5223_v0 = vpop.f32.mrf.mxu1  ;;  %2591 = vmatmul.mubr.f32.gmra.mxu1 %v4649_v62  ;;  %2895 = vmatpush1.msra.mxu0 %v5178_v21  ;;  %v6232_v62 = vand.u32 4294901760, %v5196_v19 }
 0x1eb   : > { %2897 = vmatprep.subr.mxu0 %v5175_v10  ;;  %v1019_v25 = vpop.f32.mrf.mxu0  ;;  %2596 = vmatprep.mubr.f32.mxu1 %v6211_v17  ;;  %v737_v10 = vadd.f32 %v5090_v32, %v607_v42  ;;  %v739_v42 = vadd.f32 %v5100_v2, %v609_v41 }
 0x1ec   : > { %v5234_v13 = vpop.f32.mrf.mxu1  ;;  %2899 = vmatpush1.msra.mxu0 %v5183_v31  ;;  %2689 = vmatprep.mubr.f32.mxu0 %v6211_v17  ;;  %v3064_v8 = vsub.f32 %v5196_v19, %v6232_v62  ;;  %v3070_v31 = vsub.f32 %v5205_v54, %v6233_v51  ;;  %v614_v62 = vadd.f32 %v5026_v1, %v4999_v7 }
 0x1ed   : > { %3192 = vmatprep.subr.mxu0 %v5086_v6  ;;  %v1024_v21 = vpop.f32.mrf.mxu0  ;;  %2691 = vmatmul.mubr.f32.gmra.mxu0 %v4476_v20  ;;  %v871_v32 = vadd.f32 %v5128_v27, %v737_v10  ;;  %v3059_v6 = vand.u32 4294901760, %v3058_v4  ;;  %v873_v19 = vadd.f32 %v5137_v55, %v739_v42  ;;  %v621_v27 = vadd.f32 %v5038_v9, %v5007_v33 }
 0x1ee   : > { %v5249_v46 = vpop.f32.mrf.mxu1  ;;  %2600 = vmatmul.mubr.f32.gmra.mxu1 %v4664_v12  ;;  %2696 = vmatprep.mubr.f32.mxu0 %v6211_v17  ;;  %v3065_v12 = vand.u32 4294901760, %v3064_v8  ;;  %v745_v54 = vadd.f32 %v5110_v23, %v614_v62  ;;  %v3071_v2 = vand.u32 4294901760, %v3070_v31  ;;  %v747_v10 = vadd.f32 %v5117_v44, %v616_v61 }
 0x1ef   : > { %v1026_v14 = vpop.f32.mrf.mxu0  ;;  %2807 = vmatprep.mubr.f32.mxu1 %v6211_v17  ;;  %v1018_v7 = vadd.f32 %v1017_v49, %v871_v32  ;;  %v1020_v47 = vadd.f32 %v1019_v25, %v873_v19  ;;  %v623_v31 = vadd.f32 %v5045_v63, %v5015_v53  ;;  %v753_v33 = vadd.f32 %v5125_v34, %v621_v27 }
 0x1f0   : > { %v5261_v51 = vpop.f32.mrf.mxu1  ;;  %v880_v4 = vadd.f32 %v5143_v26, %v745_v54  ;;  %v882_v23 = vadd.f32 %v5150_v29, %v747_v10  ;;  %v628_v54 = vadd.f32 %v5050_v48, %v5022_v11  ;;  %v630_v11 = vadd.f32 %v5057_v50, %v5029_v58 }
 0x1f1   : > { %v1031_v1 = vpop.f32.mrf.mxu0  ;;  %2698 = vmatmul.mubr.f32.gmra.mxu0 %v4493_v28  ;;  %v755_v53 = vadd.f32 %v5133_v30, %v623_v31  ;;  %v635_v8 = vadd.f32 %v5062_v24, %v5035_v22  ;;  %v637_v32 = vadd.f32 %v5072_v60, %v5042_v15  ;;  %v6235_v60 = vld [vmem:[#allocation56_spill] sm:$0xff] }
 0x1f2   : > { %v1142_v41 = vpop.f32.mrf.mxu1  ;;  %2809 = vmatmul.mubr.f32.vlgmr.msra.gmra.mxu1 %v4467_v16  ;;  %2703 = vmatprep.mubr.f32.mxu0 %v6211_v17  ;;  %v1025_v44 = vadd.f32 %v1024_v21, %v880_v4  ;;  %v889_v21 = vadd.f32 %v5155_v45, %v753_v33  ;;  %v1027_v63 = vadd.f32 %v1026_v14, %v882_v23  ;;  %v6237_v4 = vld [vmem:[#allocation44_spill] sm:$0xff]  ;;  %v6240_v33 = vld [vmem:[#allocation67_spill] sm:$0xff] }
 0x1f3   : > { %v1143_v18 = vadd.f32 %v1142_v41, %v1018_v7  ;;  %3060 = vmatpush1.msra.mxu1 %v3059_v6  ;;  %v1033_v49 = vpop.f32.mrf.mxu0  ;;  %2814 = vmatprep.mubr.f32.mxu1 %v6211_v17  ;;  %v761_v30 = vadd.f32 %v5140_v40, %v628_v54  ;;  %v891_v29 = vadd.f32 %v5162_v39, %v755_v53  ;;  %v6242_v54 = vld [vmem:[#allocation45_spill] sm:$0xff]  ;;  %v6243_v53 = vld [vmem:[#allocation52_spill] sm:$0xff] }
 0x1f4   : > { %3066 = vmatprep.subr.mxu1 %v3065_v12  ;;  %v1144_v9 = vpop.f32.mrf.mxu1  ;;  %v1032_v19 = vadd.f32 %v1031_v1, %v889_v21  ;;  %v763_v58 = vadd.f32 %v5146_v59, %v630_v11  ;;  %v769_v22 = vadd.f32 %v5152_v43, %v635_v8  ;;  %v771_v15 = vadd.f32 %v6235_v60, %v637_v32  ;;  %v6236_v43 = vld [vmem:[#allocation63_spill] sm:$0xff]  ;;  %v6247_v8 = vld [vmem:[#allocation62_spill] sm:$0xff] }
 0x1f5   : > { %3698 = vst [vmem:[%s5277_s10] sm:$0xff] %v1143_v18  ;;  %v1145_v26 = vadd.f32 %v1144_v9, %v1020_v47  ;;  %3072 = vmatpush1.msra.mxu1 %v3071_v2  ;;  %v1038_v6 = vpop.f32.mrf.mxu0  ;;  %2705 = vmatmul.mubr.f32.gmra.mxu0 %v4509_v36  ;;  %v898_v40 = vadd.f32 %v5167_v56, %v761_v30  ;;  %v6234_v56 = vld [vmem:[#allocation48_spill] sm:$0xff]  ;;  %v6238_v47 = vld [vmem:[#allocation51_spill] sm:$0xff]  ;;  %v6250_v32 = vld [vmem:[#allocation54_spill] sm:$0xff] }
 0x1f6   : > { %3328 = vmatprep.subr.mxu1 %v5070_v3  ;;  %v1149_v12 = vpop.f32.mrf.mxu1  ;;  %2816 = vmatmul.mubr.f32.gmra.mxu1 %v4476_v20  ;;  %v1034_v39 = vadd.f32 %v1033_v49, %v891_v29  ;;  %v900_v14 = vadd.f32 %v5180_v38, %v763_v58  ;;  %v642_v1 = vadd.f32 %v6234_v56, %v5047_v35  ;;  %v6239_v49 = vld [vmem:[#allocation57_spill] sm:$0xff]  ;;  %v6245_v29 = vld [vmem:[#allocation46_spill] sm:$0xff] }
 0x1f7   : > { %3699 = vst [vmem:[%s5277_s10 + $0x8] sm:$0xff] %v1145_v26  ;;  %v1150_v55 = vadd.f32 %v1149_v12, %v1025_v44  ;;  %v1040_v34 = vpop.f32.mrf.mxu0  ;;  %2710 = vmatprep.mubr.f32.mxu0 %v6211_v17  ;;  %2821 = vmatprep.mubr.f32.mxu1 %v6211_v17  ;;  %v1039_v61 = vadd.f32 %v1038_v6, %v898_v40  ;;  %v6241_v6 = vld [vmem:[#allocation32_spill] sm:$0xff] }
 0x1f8   : > { %v1151_v48 = vpop.f32.mrf.mxu1  ;;  %v907_v27 = vadd.f32 %v6236_v43, %v769_v22  ;;  %v1041_v38 = vadd.f32 %v1040_v34, %v900_v14  ;;  %v644_v18 = vadd.f32 %v6238_v47, %v6237_v4  ;;  %v777_v31 = vadd.f32 %v6239_v49, %v642_v1  ;;  %v6251_v14 = vld [vmem:[#allocation64_spill] sm:$0xff]  ;;  %v6252_v1 = vld [vmem:[#allocation49_spill] sm:$0xff]  ;;  %v6257_v49 = vld [vmem:[#allocation66_spill] sm:$0xff] }
 0x1f9   : > { %3706 = vst [vmem:[%s5277_s10 + $0x40] sm:$0xff] %v1150_v55  ;;  %v1152_v45 = vadd.f32 %v1151_v48, %v1027_v63  ;;  %v1045_v25 = vpop.f32.mrf.mxu0  ;;  %2712 = vmatmul.mubr.f32.gmra.mxu0 %v4543_v52  ;;  %v909_v9 = vadd.f32 %v6240_v33, %v771_v15  ;;  %v649_v12 = vadd.f32 %v6243_v53, %v6242_v54  ;;  %v6244_v63 = vld [vmem:[#allocation58_spill] sm:$0xff]  ;;  %v6254_v43 = vld [vmem:[#allocation69_spill] sm:$0xff] }
 0x1fa   : > { %v1156_v62 = vpop.f32.mrf.mxu1  ;;  %2823 = vmatmul.mubr.f32.gmra.mxu1 %v4493_v28  ;;  %2717 = vmatprep.mubr.f32.mxu0 %v6211_v17  ;;  %v1046_v23 = vadd.f32 %v1045_v25, %v907_v27  ;;  %v779_v55 = vadd.f32 %v6244_v63, %v644_v18  ;;  %v916_v34 = vadd.f32 %v5210_v37, %v777_v31  ;;  %v6248_v37 = vld [vmem:[#allocation36_spill] sm:$0xff] }
 0x1fb   : > { %3707 = vst [vmem:[%s5277_s10 + $0x48] sm:$0xff] %v1152_v45  ;;  %v1157_v50 = vadd.f32 %v1156_v62, %v1032_v19  ;;  %v1047_v42 = vpop.f32.mrf.mxu0  ;;  %2828 = vmatprep.mubr.f32.mxu1 %v6211_v17  ;;  %v6246_v19 = vld [vmem:[#allocation53_spill] sm:$0xff]  ;;  %v785_v62 = vadd.f32 %v6247_v8, %v649_v12  ;;  %v6260_v12 = vld [vmem:[#allocation50_spill] sm:$0xff]  ;;  %v6264_v8 = vld [vmem:[#allocation60_spill] sm:$0xff] }
 0x1fc   : > { %v1158_v24 = vpop.f32.mrf.mxu1  ;;  %v1048_v11 = vadd.f32 %v1047_v42, %v909_v9  ;;  %v651_v45 = vadd.f32 %v6246_v19, %v6245_v29  ;;  %v918_v58 = vadd.f32 %v5218_v57, %v779_v55  ;;  %v6249_v42 = vld [vmem:[#allocation47_spill] sm:$0xff]  ;;  %v6258_v9 = vld [vmem:[#allocation65_spill] sm:$0xff] }
 0x1fd   : > { %3714 = vst [vmem:[%s5277_s10 + $0x80] sm:$0xff] %v1157_v50  ;;  %v1159_v59 = vadd.f32 %v1158_v24, %v1034_v39  ;;  %v1052_v7 = vpop.f32.mrf.mxu0  ;;  %2719 = vmatmul.mubr.f32.gmra.mxu0 %v4583_v5  ;;  %v656_v24 = vadd.f32 %v6250_v32, %v6249_v42  ;;  %v6262_v55 = vld [vmem:[#allocation27_spill] sm:$0xff]  ;;  %v6267_v42 = vld [vmem:[#allocation34_spill] sm:$0xff] }
 0x1fe   : > { %v1163_v2 = vpop.f32.mrf.mxu1  ;;  %2830 = vmatmul.mubr.f32.gmra.mxu1 %v4509_v36  ;;  %2724 = vmatprep.mubr.f32.mxu0 %v6211_v17  ;;  %v1053_v40 = vadd.f32 %v1052_v7, %v916_v34 }
 0x1ff   : > { %3715 = vst [vmem:[%s5277_s10 + $0x88] sm:$0xff] %v1159_v59  ;;  %v1164_v10 = vadd.f32 %v1163_v2, %v1039_v61  ;;  %v1054_v41 = vpop.f32.mrf.mxu0  ;;  %2835 = vmatprep.mubr.f32.mxu1 %v6211_v17  ;;  %v787_v61 = vadd.f32 %v6251_v14, %v651_v45  ;;  %v925_v59 = vadd.f32 %v5223_v0, %v785_v62  ;;  %v6253_v2 = vld [vmem:[#allocation55_spill] sm:$0xff]  ;;  %v6255_v0 = vld [vmem:[#allocation24_spill] sm:$0xff]  ;;  %v6263_v45 = vld [vmem:[#allocation30_spill] sm:$0xff] }
 0x200   : > { %v1165_v35 = vpop.f32.mrf.mxu1  ;;  %v1055_v57 = vadd.f32 %v1054_v41, %v918_v58  ;;  %v658_v60 = vadd.f32 %v6253_v2, %v6252_v1  ;;  %v793_v27 = vadd.f32 %v6254_v43, %v656_v24  ;;  %v6256_v41 = vld [vmem:[#allocation70_spill] sm:$0xff]  ;;  %v6265_v58 = vld [vmem:[#allocation59_spill] sm:$0xff] }
 0x201   : > { %3722 = vst [vmem:[%s5277_s10 + $0xc0] sm:$0xff] %v1164_v10  ;;  %v1166_v44 = vadd.f32 %v1165_v35, %v1041_v38  ;;  %v1059_v26 = vpop.f32.mrf.mxu0  ;;  %2726 = vmatmul.mubr.f32.gmra.mxu0 %v6241_v6  ;;  %v927_v38 = vadd.f32 %v5234_v13, %v787_v61  ;;  %v6268_v61 = vld [vmem:[#allocation37_spill] sm:$0xff]  ;;  %v6270_v43 = vld [vmem:[#allocation42_spill] sm:$0xff] }
 0x202   : > { %v1170_v21 = vpop.f32.mrf.mxu1  ;;  %2837 = vmatmul.mubr.f32.gmra.mxu1 %v4543_v52  ;;  %2731 = vmatprep.mubr.f32.mxu0 %v6211_v17  ;;  %v1060_v10 = vadd.f32 %v1059_v26, %v925_v59  ;;  %v795_v18 = vadd.f32 %v6256_v41, %v658_v60  ;;  %v934_v31 = vadd.f32 %v5249_v46, %v793_v27  ;;  %v6259_v26 = vld [vmem:[#allocation68_spill] sm:$0xff] }
 0x203   : > { %3723 = vst [vmem:[%s5277_s10 + $0xc8] sm:$0xff] %v1166_v44  ;;  %v1171_v48 = vadd.f32 %v1170_v21, %v1046_v23  ;;  %v1061_v30 = vpop.f32.mrf.mxu0  ;;  %2842 = vmatprep.mubr.f32.mxu1 %v6211_v17  ;;  %v6261_v21 = vand.u32 4294901760, %v6260_v12 }
 0x204   : > { %v1172_v25 = vpop.f32.mrf.mxu1  ;;  %v1062_v33 = vadd.f32 %v1061_v30, %v927_v38  ;;  %v936_v54 = vadd.f32 %v5261_v51, %v795_v18 }
 0x205   : > { %3730 = vst [vmem:[%s5277_s10 + $0x100] sm:$0xff] %v1171_v48  ;;  %v1173_v39 = vadd.f32 %v1172_v25, %v1048_v11  ;;  %v1066_v50 = vpop.f32.mrf.mxu0  ;;  %2733 = vmatmul.mubr.f32.gmra.mxu0 %v6248_v37 }
 0x206   : > { %v1177_v22 = vpop.f32.mrf.mxu1  ;;  %2844 = vmatmul.mubr.f32.gmra.mxu1 %v4583_v5  ;;  %2932 = vmatprep.mubr.f32.mxu0 %v6211_v17  ;;  %v1067_v53 = vadd.f32 %v1066_v50, %v934_v31 }
 0x207   : > { %3731 = vst [vmem:[%s5277_s10 + $0x108] sm:$0xff] %v1173_v39  ;;  %v1178_v7 = vadd.f32 %v1177_v22, %v1053_v40  ;;  %v1068_v56 = vpop.f32.mrf.mxu0  ;;  %2849 = vmatprep.mubr.f32.mxu1 %v6211_v17  ;;  %v6266_v39 = vld [vmem:[#allocation61_spill] sm:$0xff] }
 0x208   : > { %v1179_v15 = vpop.f32.mrf.mxu1  ;;  %v1069_v11 = vadd.f32 %v1068_v56, %v936_v54  ;;  %v6269_v56 = vld [vmem:[#allocation40_spill] sm:$0xff] }
 0x209   : > { %3738 = vst [vmem:[%s5277_s10 + $0x140] sm:$0xff] %v1178_v7  ;;  %v1180_v4 = vadd.f32 %v1179_v15, %v1055_v57  ;;  %v5351_v47 = vpop.f32.mrf.mxu0  ;;  %2938 = vmatmul.mubr.f32.vlgmr.msra.gmra.mxu0 %v6255_v0  ;;  %v6273_v0 = vld [vmem:[#allocation43_spill] sm:$0xff] }
 0x20a   : > { %v1184_v35 = vpop.f32.mrf.mxu1  ;;  %2851 = vmatmul.mubr.f32.gmra.mxu1 %v6241_v6  ;;  %3195 = vmatpush1.msra.mxu0 %v6257_v49 }
 0x20b   : > { %3739 = vst [vmem:[%s5277_s10 + $0x148] sm:$0xff] %v1180_v4  ;;  %v1185_v13 = vadd.f32 %v1184_v35, %v1060_v10  ;;  %3198 = vmatprep.subr.mxu0 %v6258_v9  ;;  %v5360_v23 = vpop.f32.mrf.mxu0  ;;  %2856 = vmatprep.mubr.f32.mxu1 %v6211_v17 }
 0x20c   : > { %v1186_v44 = vpop.f32.mrf.mxu1  ;;  %3201 = vmatpush1.msra.mxu0 %v6259_v26  ;;  %2943 = vmatprep.mubr.f32.mxu0 %v6211_v17 }
 0x20d   : > { %3746 = vst [vmem:[%s5277_s10 + $0x180] sm:$0xff] %v1185_v13  ;;  %v1187_v46 = vadd.f32 %v1186_v44, %v1062_v33  ;;  %3471 = vmatprep.subr.mxu0 %v6261_v21  ;;  %v5369_v63 = vpop.f32.mrf.mxu0  ;;  %2949 = vmatmul.mubr.f32.gmra.mxu0 %v6262_v55  ;;  %v6275_v33 = vld [vmem:[#allocation18_spill] sm:$0xff]  ;;  %v6277_v44 = vand.u32 4294901760, %v6257_v49  ;;  %v6280_v21 = vld [vmem:[#allocation20_spill] sm:$0xff] }
 0x20e   : > { %v1191_v34 = vpop.f32.mrf.mxu1  ;;  %2858 = vmatmul.mubr.f32.gmra.mxu1 %v6248_v37  ;;  %2954 = vmatprep.mubr.f32.mxu0 %v6211_v17 }
 0x20f   : > { %3747 = vst [vmem:[%s5277_s10 + $0x188] sm:$0xff] %v1187_v46  ;;  %v1192_v51 = vadd.f32 %v1191_v34, %v1067_v53  ;;  %v5375_v48 = vpop.f32.mrf.mxu0  ;;  %3105 = vmatprep.mubr.f32.mxu1 %v6211_v17  ;;  %v6279_v46 = vand.u32 4294901760, %v6258_v9  ;;  %v6282_v34 = vand.u32 4294901760, %v6259_v26 }
 0x210   : > { %v1193_v30 = vpop.f32.mrf.mxu1 }
 0x211   : > { %3754 = vst [vmem:[%s5277_s10 + $0x1c0] sm:$0xff] %v1192_v51  ;;  %v1194_v29 = vadd.f32 %v1193_v30, %v1069_v11  ;;  %v5379_v19 = vpop.f32.mrf.mxu0  ;;  %2960 = vmatmul.mubr.f32.gmra.mxu0 %v6263_v45  ;;  %v6284_v51 = vld [vmem:[#allocation22_spill] sm:$0xff] }
 0x212   : > { %v5382_v25 = vpop.f32.mrf.mxu1  ;;  %3107 = vmatmul.mubr.f32.vlgmr.msra.gmra.mxu1 %v4467_v16  ;;  %2965 = vmatprep.mubr.f32.mxu0 %v6211_v17 }
 0x213   : > { %3755 = vst [vmem:[%s5277_s10 + $0x1c8] sm:$0xff] %v1194_v29  ;;  %3330 = vmatpush1.msra.mxu1 %v6264_v8  ;;  %v5388_v62 = vpop.f32.mrf.mxu0  ;;  %3112 = vmatprep.mubr.f32.mxu1 %v6211_v17  ;;  %v6285_v29 = vld [vmem:[#allocation19_spill] sm:$0xff] }
 0x214   : > { %3332 = vmatprep.subr.mxu1 %v6265_v58  ;;  %v5392_v40 = vpop.f32.mrf.mxu1 }
 0x215   : > { %3334 = vmatpush1.msra.mxu1 %v6266_v39  ;;  %v5395_v50 = vpop.f32.mrf.mxu0  ;;  %2971 = vmatmul.mubr.f32.gmra.mxu0 %v6267_v42 }
 0x216   : > { %3602 = vmatprep.subr.mxu1 %v5070_v3  ;;  %v5399_v32 = vpop.f32.mrf.mxu1  ;;  %3114 = vmatmul.mubr.f32.gmra.mxu1 %v4476_v20 }
 0x217   : > { %v5402_v24 = vpop.f32.mrf.mxu0  ;;  %2976 = vmatprep.mubr.f32.mxu0 %v6211_v17  ;;  %3119 = vmatprep.mubr.f32.mxu1 %v6211_v17 }
 0x218   : > { %v5406_v22 = vpop.f32.mrf.mxu1 }
 0x219   : > { %v5408_v14 = vpop.f32.mrf.mxu0  ;;  %2982 = vmatmul.mubr.f32.gmra.mxu0 %v6268_v61  ;;  %v6286_v61 = vld [vmem:[#allocation23_spill] sm:$0xff] }
 0x21a   : > { %v5411_v59 = vpop.f32.mrf.mxu1  ;;  %3121 = vmatmul.mubr.f32.gmra.mxu1 %v4493_v28  ;;  %2987 = vmatprep.mubr.f32.mxu0 %v6211_v17 }
 0x21b   : > { %v5415_v3 = vpop.f32.mrf.mxu0  ;;  %3126 = vmatprep.mubr.f32.mxu1 %v6211_v17 }
 0x21c   : > { %v5418_v57 = vpop.f32.mrf.mxu1 }
 0x21d   : > { %v5420_v7 = vpop.f32.mrf.mxu0  ;;  %2993 = vmatmul.mubr.f32.gmra.mxu0 %v6269_v56 }
 0x21e   : > { %v5423_v1 = vpop.f32.mrf.mxu1  ;;  %3128 = vmatmul.mubr.f32.gmra.mxu1 %v4509_v36  ;;  %2998 = vmatprep.mubr.f32.mxu0 %v6211_v17 }
 0x21f   : > { %v5427_v2 = vpop.f32.mrf.mxu0  ;;  %3133 = vmatprep.mubr.f32.mxu1 %v6211_v17 }
 0x220   : > { %v5430_v60 = vpop.f32.mrf.mxu1 }
 0x221   : > { %v5432_v15 = vpop.f32.mrf.mxu0  ;;  %3004 = vmatmul.mubr.f32.gmra.mxu0 %v6270_v43  ;;  %v6287_v43 = vld [vmem:[#allocation21_spill] sm:$0xff] }
 0x222   : > { %v5435_v27 = vpop.f32.mrf.mxu1  ;;  %3135 = vmatmul.mubr.f32.gmra.mxu1 %v4543_v52  ;;  %3009 = vmatprep.mubr.f32.mxu0 %v6211_v17 }
 0x223   : > { %v5439_v38 = vpop.f32.mrf.mxu0  ;;  %3140 = vmatprep.mubr.f32.mxu1 %v6211_v17 }
 0x224   : > { %6271 = vst [vmem:[#allocation48_spill] sm:$0xff] %v5439_v38  ;;  %v5442_v10 = vpop.f32.mrf.mxu1 }
 0x225   : > { %v5444_v4 = vpop.f32.mrf.mxu0  ;;  %3015 = vmatmul.mubr.f32.gmra.mxu0 %v6273_v0 }
 0x226   : > { %6272 = vst [vmem:[#allocation56_spill] sm:$0xff] %v5444_v4  ;;  %v5447_v41 = vpop.f32.mrf.mxu1  ;;  %3142 = vmatmul.mubr.f32.gmra.mxu1 %v4583_v5  ;;  %3234 = vmatprep.mubr.f32.mxu0 %v6211_v17 }
 0x227   : > { %v5451_v18 = vpop.f32.mrf.mxu0  ;;  %3147 = vmatprep.mubr.f32.mxu1 %v6211_v17 }
 0x228   : > { %6274 = vst [vmem:[#allocation63_spill] sm:$0xff] %v5451_v18  ;;  %v5454_v35 = vpop.f32.mrf.mxu1 }
 0x229   : > { %v5456_v31 = vpop.f32.mrf.mxu0  ;;  %3237 = vmatmul.mubr.f32.vlgmr.msra.gmra.mxu0 %v6275_v33 }
 0x22a   : > { %v5459_v13 = vpop.f32.mrf.mxu1  ;;  %3149 = vmatmul.mubr.f32.gmra.mxu1 %v6241_v6  ;;  %3475 = vmatpush1.msra.mxu0 %v6277_v44 }
 0x22b   : > { %6276 = vst [vmem:[#allocation44_spill] sm:$0xff] %v5459_v13  ;;  %v5464_v54 = vpop.f32.mrf.mxu0  ;;  %3154 = vmatprep.mubr.f32.mxu1 %v6211_v17  ;;  %3242 = vmatprep.mubr.f32.mxu0 %v6211_v17 }
 0x22c   : > { %v5468_v53 = vpop.f32.mrf.mxu1  ;;  %3479 = vmatprep.subr.mxu0 %v6279_v46  ;;  %v6289_v46 = vld [vmem:[#allocation25_spill] sm:$0xff] }
 0x22d   : > { %6278 = vst [vmem:[#allocation51_spill] sm:$0xff] %v5468_v53  ;;  %v5472_v12 = vpop.f32.mrf.mxu0  ;;  %3245 = vmatmul.mubr.f32.gmra.mxu0 %v6280_v21 }
 0x22e   : > { %v5475_v55 = vpop.f32.mrf.mxu1  ;;  %3156 = vmatmul.mubr.f32.gmra.mxu1 %v6248_v37  ;;  %3250 = vmatprep.mubr.f32.mxu0 %v6211_v17  ;;  %v6298_v37 = vld [vmem:[#allocation39_spill] sm:$0xff] }
 0x22f   : > { %6281 = vst [vmem:[#allocation57_spill] sm:$0xff] %v5475_v55  ;;  %v5479_v49 = vpop.f32.mrf.mxu0  ;;  %3367 = vmatprep.mubr.f32.mxu1 %v6211_v17  ;;  %3483 = vmatpush1.msra.mxu0 %v6282_v34  ;;  %v6295_v55 = vld [vmem:[#allocation31_spill] sm:$0xff] }
 0x230   : > { %v5484_v11 = vpop.f32.mrf.mxu1 }
 0x231   : > { %6283 = vst [vmem:[#allocation67_spill] sm:$0xff] %v5484_v11  ;;  %v5486_v9 = vpop.f32.mrf.mxu0  ;;  %3253 = vmatmul.mubr.f32.gmra.mxu0 %v6284_v51  ;;  %v6290_v51 = vld [vmem:[#allocation29_spill] sm:$0xff]  ;;  %v6294_v11 = vld [vmem:[#allocation35_spill] sm:$0xff] }
 0x232   : > { %v5489_v30 = vpop.f32.mrf.mxu1  ;;  %3371 = vmatmul.mubr.f32.vlgmr.msra.gmra.mxu1 %v6285_v29  ;;  %3258 = vmatprep.mubr.f32.mxu0 %v6211_v17 }
 0x233   : > { %3604 = vmatpush1.msra.mxu1 %v6264_v8  ;;  %v5494_v45 = vpop.f32.mrf.mxu0  ;;  %3376 = vmatprep.mubr.f32.mxu1 %v6211_v17 }
 0x234   : > { %v5497_v26 = vpop.f32.mrf.mxu1  ;;  %3606 = vmatprep.subr.mxu1 %v6265_v58  ;;  %v6288_v58 = vld [vmem:[#allocation28_spill] sm:$0xff] }
 0x235   : > { %v5500_v42 = vpop.f32.mrf.mxu0  ;;  %3261 = vmatmul.mubr.f32.gmra.mxu0 %v6286_v61  ;;  %3608 = vmatpush1.msra.mxu1 %v6266_v39  ;;  %v6291_v61 = vld [vmem:[#allocation26_spill] sm:$0xff] }
 0x236   : > { %v5504_v56 = vpop.f32.mrf.mxu1  ;;  %3380 = vmatmul.mubr.f32.gmra.mxu1 %v6287_v43  ;;  %3266 = vmatprep.mubr.f32.mxu0 %v6211_v17 }
 0x237   : > { %v5508_v8 = vpop.f32.mrf.mxu0  ;;  %3385 = vmatprep.mubr.f32.mxu1 %v6211_v17 }
 0x238   : > { %v5511_v0 = vpop.f32.mrf.mxu1 }
 0x239   : > { %v5513_v33 = vpop.f32.mrf.mxu0  ;;  %3269 = vmatmul.mubr.f32.gmra.mxu0 %v6288_v58 }
 0x23a   : > { %v5516_v44 = vpop.f32.mrf.mxu1  ;;  %3389 = vmatmul.mubr.f32.gmra.mxu1 %v6289_v46  ;;  %3274 = vmatprep.mubr.f32.mxu0 %v6211_v17 }
 0x23b   : > { %v5520_v39 = vpop.f32.mrf.mxu0  ;;  %3394 = vmatprep.mubr.f32.mxu1 %v6211_v17 }
 0x23c   : > { %v5523_v21 = vpop.f32.mrf.mxu1 }
 0x23d   : > { %v5525_v34 = vpop.f32.mrf.mxu0  ;;  %3277 = vmatmul.mubr.f32.gmra.mxu0 %v6290_v51 }
 0x23e   : > { %v5528_v29 = vpop.f32.mrf.mxu1  ;;  %3398 = vmatmul.mubr.f32.gmra.mxu1 %v6291_v61  ;;  %3282 = vmatprep.mubr.f32.mxu0 %v6211_v17 }
 0x23f   : > { %v5532_v43 = vpop.f32.mrf.mxu0  ;;  %3403 = vmatprep.mubr.f32.mxu1 %v6211_v17 }
 0x240   : > { %6292 = vst [vmem:[#allocation32_spill] sm:$0xff] %v5532_v43  ;;  %v5535_v58 = vpop.f32.mrf.mxu1 }
 0x241   : > { %v5537_v46 = vpop.f32.mrf.mxu0  ;;  %3285 = vmatmul.mubr.f32.gmra.mxu0 %v6294_v11 }
 0x242   : > { %6293 = vst [vmem:[#allocation45_spill] sm:$0xff] %v5537_v46  ;;  %v5540_v18 = vpop.f32.mrf.mxu1  ;;  %3407 = vmatmul.mubr.f32.gmra.mxu1 %v6295_v55  ;;  %3290 = vmatprep.mubr.f32.mxu0 %v6211_v17  ;;  %v6300_v46 = vld [vmem:[#allocation33_spill] sm:$0xff] }
 0x243   : > { %v5544_v51 = vpop.f32.mrf.mxu0  ;;  %3412 = vmatprep.mubr.f32.mxu1 %v6211_v17 }
 0x244   : > { %6296 = vst [vmem:[#allocation52_spill] sm:$0xff] %v5544_v51  ;;  %v5547_v61 = vpop.f32.mrf.mxu1 }
 0x245   : > { %v5549_v4 = vpop.f32.mrf.mxu0  ;;  %3293 = vmatmul.mubr.f32.gmra.mxu0 %v6298_v37  ;;  %v1441_v37 = vadd.f32 %v5382_v25, %v5351_v47  ;;  %v1448_v47 = vadd.f32 %v5399_v32, %v5369_v63  ;;  %v1455_v63 = vadd.f32 %v5411_v59, %v5379_v19 }
 0x246   : > { %6297 = vst [vmem:[#allocation58_spill] sm:$0xff] %v5549_v4  ;;  %v5552_v53 = vpop.f32.mrf.mxu1  ;;  %3416 = vmatmul.mubr.f32.gmra.mxu1 %v6300_v46  ;;  %3516 = vmatprep.mubr.f32.mxu0 %v6211_v17  ;;  %v6304_v4 = vld [vmem:[#allocation38_spill] sm:$0xff] }
 0x247   : > { %6299 = vst [vmem:[#allocation46_spill] sm:$0xff] %v5552_v53  ;;  %v5556_v11 = vpop.f32.mrf.mxu0  ;;  %3421 = vmatprep.mubr.f32.mxu1 %v6211_v17  ;;  %v1571_v53 = vadd.f32 %v5456_v31, %v1441_v37  ;;  %v1579_v31 = vadd.f32 %v5472_v12, %v1448_v47  ;;  %v1587_v19 = vadd.f32 %v5486_v9, %v1455_v63 }
 0x248   : > { %6301 = vst [vmem:[#allocation53_spill] sm:$0xff] %v5556_v11  ;;  %v5559_v55 = vpop.f32.mrf.mxu1  ;;  %v1478_v63 = vadd.f32 %v5454_v35, %v5427_v2  ;;  %v6309_v2 = vld [vmem:[#allocation32_spill] sm:$0xff] }
 0x249   : > { %6302 = vst [vmem:[#allocation62_spill] sm:$0xff] %v5559_v55  ;;  %v1851_v51 = vpop.f32.mrf.mxu0  ;;  %3518 = vmatmul.mubr.f32.vlgmr.msra.gmra.mxu0 %v4467_v16  ;;  %v1443_v55 = vadd.f32 %v5392_v40, %v5360_v23  ;;  %v1450_v40 = vadd.f32 %v5406_v22, %v5375_v48  ;;  %v1714_v48 = vadd.f32 %v5504_v56, %v1579_v31 }
 0x24a   : > { %v5562_v38 = vpop.f32.mrf.mxu1  ;;  %3425 = vmatmul.mubr.f32.gmra.mxu1 %v6304_v4  ;;  %3523 = vmatprep.mubr.f32.mxu0 %v6211_v17  ;;  %v6307_v4 = vld [vmem:[#allocation41_spill] sm:$0xff]  ;;  %v1462_v56 = vadd.f32 %v5423_v1, %v5395_v50  ;;  %v1613_v35 = vadd.f32 %v6309_v2, %v1478_v63 }
 0x24b   : > { %6303 = vst [vmem:[#allocation47_spill] sm:$0xff] %v5562_v38  ;;  %v1853_v46 = vpop.f32.mrf.mxu0  ;;  %3430 = vmatprep.mubr.f32.mxu1 %v6211_v17  ;;  %v1573_v25 = vadd.f32 %v5464_v54, %v1443_v55  ;;  %v1581_v54 = vadd.f32 %v5479_v49, %v1450_v40  ;;  %v1464_v55 = vadd.f32 %v5430_v60, %v5402_v24 }
 0x24c   : > { %v5569_v11 = vpop.f32.mrf.mxu1  ;;  %v1595_v1 = vadd.f32 %v5500_v42, %v1462_v56 }
 0x24d   : > { %6305 = vst [vmem:[#allocation54_spill] sm:$0xff] %v5569_v11  ;;  %v1858_v43 = vpop.f32.mrf.mxu0  ;;  %3525 = vmatmul.mubr.f32.gmra.mxu0 %v4476_v20  ;;  %v1705_v11 = vadd.f32 %v5489_v30, %v1571_v53  ;;  %v1707_v37 = vadd.f32 %v5497_v26, %v1573_v25  ;;  %v1457_v30 = vadd.f32 %v5418_v57, %v5388_v62 }
 0x24e   : > { %v5575_v38 = vpop.f32.mrf.mxu1  ;;  %3434 = vmatmul.mubr.f32.gmra.mxu1 %v6307_v4  ;;  %3530 = vmatprep.mubr.f32.mxu0 %v6211_v17  ;;  %v1859_v59 = vadd.f32 %v1858_v43, %v1714_v48  ;;  %v1723_v57 = vadd.f32 %v5516_v44, %v1587_v19  ;;  %v1597_v24 = vadd.f32 %v5508_v8, %v1464_v55  ;;  %v6312_v19 = vld [vmem:[#allocation51_spill] sm:$0xff] }
 0x24f   : > { %6306 = vst [vmem:[#allocation64_spill] sm:$0xff] %v5575_v38  ;;  %v1860_v13 = vpop.f32.mrf.mxu0  ;;  %3641 = vmatprep.mubr.f32.mxu1 %v6211_v17  ;;  %v1852_v4 = vadd.f32 %v1851_v51, %v1705_v11  ;;  %v1854_v22 = vadd.f32 %v1853_v46, %v1707_v37  ;;  %v1589_v62 = vadd.f32 %v5494_v45, %v1457_v30 }
 0x250   : > { %v5584_v23 = vpop.f32.mrf.mxu1  ;;  %v1732_v60 = vadd.f32 %v5528_v29, %v1595_v1  ;;  %v1471_v25 = vadd.f32 %v5442_v10, %v5415_v3  ;;  %v1476_v29 = vadd.f32 %v5447_v41, %v5420_v7 }
 0x251   : > { %v1865_v38 = vpop.f32.mrf.mxu0  ;;  %3532 = vmatmul.mubr.f32.gmra.mxu0 %v4493_v28 }
 0x252   : > { %v1976_v32 = vpop.f32.mrf.mxu1  ;;  %3643 = vmatmul.mubr.f32.vlgmr.msra.gmra.mxu1 %v4467_v16  ;;  %3537 = vmatprep.mubr.f32.mxu0 %v6211_v17  ;;  %v1716_v16 = vadd.f32 %v5511_v0, %v1581_v54  ;;  %v1866_v46 = vadd.f32 %v1865_v38, %v1723_v57  ;;  %v1605_v3 = vadd.f32 %v5520_v39, %v1471_v25  ;;  %v6315_v57 = vld [vmem:[#allocation36_spill] sm:$0xff] }
 0x253   : > { %v1977_v53 = vadd.f32 %v1976_v32, %v1852_v4  ;;  %v1867_v12 = vpop.f32.mrf.mxu0  ;;  %3648 = vmatprep.mubr.f32.mxu1 %v6211_v17  ;;  %v1611_v41 = vadd.f32 %v5525_v34, %v1476_v29  ;;  %v6310_v34 = vld [vmem:[#allocation46_spill] sm:$0xff] }
 0x254   : > { %v1978_v26 = vpop.f32.mrf.mxu1  ;;  %v1861_v9 = vadd.f32 %v1860_v13, %v1716_v16  ;;  %v1469_v13 = vadd.f32 %v5435_v27, %v5408_v14  ;;  %v6323_v25 = vld [vmem:[#allocation54_spill] sm:$0xff] }
 0x255   : > { %3700 = vst [vmem:[%s5277_s10 + $0x10] sm:$0xff] %v1977_v53  ;;  %v1979_v51 = vadd.f32 %v1978_v26, %v1854_v22  ;;  %v1872_v49 = vpop.f32.mrf.mxu0  ;;  %3539 = vmatmul.mubr.f32.gmra.mxu0 %v4509_v36  ;;  %v1750_v53 = vadd.f32 %v6310_v34, %v1611_v41  ;;  %v6311_v26 = vld [vmem:[#allocation48_spill] sm:$0xff] }
 0x256   : > { %v1983_v11 = vpop.f32.mrf.mxu1  ;;  %3650 = vmatmul.mubr.f32.gmra.mxu1 %v4476_v20  ;;  %3544 = vmatprep.mubr.f32.mxu0 %v6211_v17  ;;  %v1725_v20 = vadd.f32 %v5523_v21, %v1589_v62  ;;  %v1603_v27 = vadd.f32 %v5513_v33, %v1469_v13  ;;  %v1873_v40 = vadd.f32 %v1872_v49, %v1732_v60  ;;  %v6325_v29 = vld [vmem:[#allocation64_spill] sm:$0xff] }
 0x257   : > { %3701 = vst [vmem:[%s5277_s10 + $0x18] sm:$0xff] %v1979_v51  ;;  %v1984_v0 = vadd.f32 %v1983_v11, %v1859_v59  ;;  %v1874_v43 = vpop.f32.mrf.mxu0  ;;  %3655 = vmatprep.mubr.f32.mxu1 %v6211_v17  ;;  %v6313_v59 = vld [vmem:[#allocation45_spill] sm:$0xff] }
 0x258   : > { %v1985_v50 = vpop.f32.mrf.mxu1  ;;  %v1868_v42 = vadd.f32 %v1867_v12, %v1725_v20  ;;  %v1741_v10 = vadd.f32 %v5540_v18, %v1603_v27  ;;  %v6308_v18 = vld [vmem:[#allocation44_spill] sm:$0xff]  ;;  %v6319_v20 = vld [vmem:[#allocation47_spill] sm:$0xff] }
 0x259   : > { %3708 = vst [vmem:[%s5277_s10 + $0x50] sm:$0xff] %v1984_v0  ;;  %v1986_v45 = vadd.f32 %v1985_v50, %v1861_v9  ;;  %v1879_v47 = vpop.f32.mrf.mxu0  ;;  %3546 = vmatmul.mubr.f32.gmra.mxu0 %v4543_v52  ;;  %v1483_v48 = vadd.f32 %v6308_v18, %v5432_v15  ;;  %v1485_v15 = vadd.f32 %v6312_v19, %v6311_v26  ;;  %v6316_v9 = vld [vmem:[#allocation56_spill] sm:$0xff]  ;;  %v6317_v0 = vld [vmem:[#allocation57_spill] sm:$0xff] }
 0x25a   : > { %v1990_v44 = vpop.f32.mrf.mxu1  ;;  %3657 = vmatmul.mubr.f32.gmra.mxu1 %v4493_v28  ;;  %3551 = vmatprep.mubr.f32.mxu0 %v6211_v17  ;;  %v1734_v28 = vadd.f32 %v5535_v58, %v1597_v24  ;;  %v1880_v32 = vadd.f32 %v1879_v47, %v1741_v10  ;;  %v6318_v50 = vld [vmem:[#allocation52_spill] sm:$0xff]  ;;  %v6321_v24 = vld [vmem:[#allocation67_spill] sm:$0xff] }
 0x25b   : > { %3709 = vst [vmem:[%s5277_s10 + $0x58] sm:$0xff] %v1986_v45  ;;  %v1991_v38 = vadd.f32 %v1990_v44, %v1866_v46  ;;  %v1881_v21 = vpop.f32.mrf.mxu0  ;;  %3662 = vmatprep.mubr.f32.mxu1 %v6211_v17  ;;  %v1619_v51 = vadd.f32 %v6313_v59, %v1483_v48  ;;  %v1621_v1 = vadd.f32 %v6318_v50, %v1485_v15  ;;  %v6320_v44 = vld [vmem:[#allocation63_spill] sm:$0xff] }
 0x25c   : > { %v1992_v14 = vpop.f32.mrf.mxu1  ;;  %v1875_v33 = vadd.f32 %v1874_v43, %v1734_v28  ;;  %v1490_v43 = vadd.f32 %v6317_v0, %v6316_v9  ;;  %v1492_v60 = vadd.f32 %v6321_v24, %v6320_v44 }
 0x25d   : > { %3716 = vst [vmem:[%s5277_s10 + $0x90] sm:$0xff] %v1991_v38  ;;  %v1993_v8 = vadd.f32 %v1992_v14, %v1868_v42  ;;  %v1886_v31 = vpop.f32.mrf.mxu0  ;;  %3553 = vmatmul.mubr.f32.gmra.mxu0 %v4583_v5  ;;  %v1759_v46 = vadd.f32 %v6319_v20, %v1619_v51  ;;  %v6322_v38 = vld [vmem:[#allocation58_spill] sm:$0xff]  ;;  %v1761_v14 = vadd.f32 %v6323_v25, %v1621_v1 }
 0x25e   : > { %v1997_v37 = vpop.f32.mrf.mxu1  ;;  %3664 = vmatmul.mubr.f32.gmra.mxu1 %v4509_v36  ;;  %3558 = vmatprep.mubr.f32.mxu0 %v6211_v17  ;;  %v1743_v36 = vadd.f32 %v5547_v61, %v1605_v3  ;;  %v1887_v56 = vadd.f32 %v1886_v31, %v1750_v53 }
 0x25f   : > { %3717 = vst [vmem:[%s5277_s10 + $0x98] sm:$0xff] %v1993_v8  ;;  %v1998_v58 = vadd.f32 %v1997_v37, %v1873_v40  ;;  %v1888_v4 = vpop.f32.mrf.mxu0  ;;  %3669 = vmatprep.mubr.f32.mxu1 %v6211_v17  ;;  %v6324_v8 = vld [vmem:[#allocation53_spill] sm:$0xff] }
 0x260   : > { %v1999_v7 = vpop.f32.mrf.mxu1  ;;  %v1882_v61 = vadd.f32 %v1881_v21, %v1743_v36  ;;  %v1627_v21 = vadd.f32 %v6322_v38, %v1490_v43  ;;  %v1629_v31 = vadd.f32 %v6324_v8, %v1492_v60 }
 0x261   : > { %3724 = vst [vmem:[%s5277_s10 + $0xd0] sm:$0xff] %v1998_v58  ;;  %v2000_v39 = vadd.f32 %v1999_v7, %v1875_v33  ;;  %v1893_v54 = vpop.f32.mrf.mxu0  ;;  %3560 = vmatmul.mubr.f32.gmra.mxu0 %v6241_v6 }
 0x262   : > { %v2004_v22 = vpop.f32.mrf.mxu1  ;;  %3671 = vmatmul.mubr.f32.gmra.mxu1 %v4543_v52  ;;  %3565 = vmatprep.mubr.f32.mxu0 %v6211_v17  ;;  %v6314_v52 = vld [vmem:[#allocation62_spill] sm:$0xff]  ;;  %v1768_v37 = vadd.f32 %v6325_v29, %v1627_v21 }
 0x263   : > { %3725 = vst [vmem:[%s5277_s10 + $0xd8] sm:$0xff] %v2000_v39  ;;  %v2005_v12 = vadd.f32 %v2004_v22, %v1880_v32  ;;  %v1895_v30 = vpop.f32.mrf.mxu0  ;;  %3676 = vmatprep.mubr.f32.mxu1 %v6211_v17  ;;  %v1752_v49 = vadd.f32 %v6314_v52, %v1613_v35 }
 0x264   : > { %v2006_v16 = vpop.f32.mrf.mxu1  ;;  %v1896_v3 = vadd.f32 %v1895_v30, %v1761_v14 }
 0x265   : > { %3732 = vst [vmem:[%s5277_s10 + $0x110] sm:$0xff] %v2005_v12  ;;  %v2007_v11 = vadd.f32 %v2006_v16, %v1882_v61  ;;  %v1900_v62 = vpop.f32.mrf.mxu0  ;;  %3567 = vmatmul.mubr.f32.gmra.mxu0 %v6315_v57  ;;  %v1889_v45 = vadd.f32 %v1888_v4, %v1752_v49  ;;  %v1770_v4 = vadd.f32 %v5584_v23, %v1629_v31 }
 0x266   : > { %v2011_v55 = vpop.f32.mrf.mxu1  ;;  %3678 = vmatmul.mubr.f32.gmra.mxu1 %v4583_v5  ;;  %v1894_v5 = vadd.f32 %v1893_v54, %v1759_v46  ;;  %v1901_v63 = vadd.f32 %v1900_v62, %v1768_v37 }
 0x267   : > { %3733 = vst [vmem:[%s5277_s10 + $0x118] sm:$0xff] %v2007_v11  ;;  %v2012_v47 = vadd.f32 %v2011_v55, %v1887_v56  ;;  %v1902_v13 = vpop.f32.mrf.mxu0  ;;  %3683 = vmatprep.mubr.f32.mxu1 %v6211_v17 }
 0x268   : > { %v2013_v42 = vpop.f32.mrf.mxu1  ;;  %v1903_v36 = vadd.f32 %v1902_v13, %v1770_v4 }
 0x269   : > { %3740 = vst [vmem:[%s5277_s10 + $0x150] sm:$0xff] %v2012_v47  ;;  %v2014_v27 = vadd.f32 %v2013_v42, %v1889_v45  ;;  %v5672_v28 = vpop.f32.mrf.mxu0 }
 0x26a   : > { %v2018_v40 = vpop.f32.mrf.mxu1  ;;  %3685 = vmatmul.mubr.f32.gmra.mxu1 %v6241_v6 }
 0x26b   : > { %3741 = vst [vmem:[%s5277_s10 + $0x158] sm:$0xff] %v2014_v27  ;;  %v2019_v10 = vadd.f32 %v2018_v40, %v1894_v5  ;;  %v5678_v33 = vpop.f32.mrf.mxu0  ;;  %3690 = vmatprep.mubr.f32.mxu1 %v6211_v17 }
 0x26c   : > { %v2020_v58 = vpop.f32.mrf.mxu1 }
 0x26d   : > { %3748 = vst [vmem:[%s5277_s10 + $0x190] sm:$0xff] %v2019_v10  ;;  %v2021_v6 = vadd.f32 %v2020_v58, %v1896_v3  ;;  %v5683_v7 = vpop.f32.mrf.mxu0 }
 0x26e   : > { %v2025_v41 = vpop.f32.mrf.mxu1  ;;  %3692 = vmatmul.mubr.f32.gmra.mxu1 %v6315_v57 }
 0x26f   : > { %3749 = vst [vmem:[%s5277_s10 + $0x198] sm:$0xff] %v2021_v6  ;;  %v2026_v32 = vadd.f32 %v2025_v41, %v1901_v63  ;;  %v5687_v39 = vpop.f32.mrf.mxu0 }
 0x270   : > { %v2027_v54 = vpop.f32.mrf.mxu1 }
 0x271   : > { %3756 = vst [vmem:[%s5277_s10 + $0x1d0] sm:$0xff] %v2026_v32  ;;  %v2028_v17 = vadd.f32 %v2027_v54, %v1903_v36  ;;  %v5690_v18 = vpop.f32.mrf.mxu0 }
 0x272   : > { %v2274_v23 = vpop.f32.mrf.mxu1 }
 0x273   : > { %3757 = vst [vmem:[%s5277_s10 + $0x1d8] sm:$0xff] %v2028_v17  ;;  %v5693_v48 = vpop.f32.mrf.mxu0  ;;  %v2275_v54 = vadd.f32 %v2274_v23, %v5672_v28 }
 0x274   : > { %v2276_v22 = vpop.f32.mrf.mxu1 }
 0x275   : > { %v5695_v2 = vpop.f32.mrf.mxu0 }
 0x276   : > { %v2281_v35 = vpop.f32.mrf.mxu1 }
 0x277   : > { %v5697_v34 = vpop.f32.mrf.mxu0 }
 0x278   : > { %v5699_v53 = vpop.f32.mrf.mxu1 }
 0x279   : > { %v5701_v61 = vpop.f32.mrf.mxu0 }
 0x27a   : > { %v5703_v12 = vpop.f32.mrf.mxu1 }
 0x27b   : > { %v5705_v30 = vpop.f32.mrf.mxu0 }
 0x27c   : > { %v5707_v26 = vpop.f32.mrf.mxu1 }
 0x27d   : > { %v5709_v19 = vpop.f32.mrf.mxu0 }
 0x27e   : > { %v5711_v15 = vpop.f32.mrf.mxu1 }
 0x27f   : > { %v5713_v16 = vpop.f32.mrf.mxu0 }
 0x280   : > { %v5715_v59 = vpop.f32.mrf.mxu1 }
 0x281   : > { %v5717_v51 = vpop.f32.mrf.mxu0 }
 0x282   : > { %v5719_v52 = vpop.f32.mrf.mxu1 }
 0x283   : > { %v5721_v49 = vpop.f32.mrf.mxu0 }
 0x284   : > { %6326 = vst [vmem:[#allocation49_spill] sm:$0xff] %v5721_v49  ;;  %v5723_v56 = vpop.f32.mrf.mxu1 }
 0x285   : > { %v5725_v11 = vpop.f32.mrf.mxu0 }
 0x286   : > { %6327 = vst [vmem:[#allocation55_spill] sm:$0xff] %v5725_v11  ;;  %v5727_v62 = vpop.f32.mrf.mxu1 }
 0x287   : > { %v5729_v57 = vpop.f32.mrf.mxu0 }
 0x288   : > { %6328 = vst [vmem:[#allocation69_spill] sm:$0xff] %v5729_v57  ;;  %v5731_v9 = vpop.f32.mrf.mxu1  ;;  %v2277_v57 = vadd.f32 %v2276_v22, %v5678_v33  ;;  %v2289_v33 = vadd.f32 %v5703_v12, %v5690_v18  ;;  %v2296_v18 = vadd.f32 %v5711_v15, %v5695_v2  ;;  %v2303_v15 = vadd.f32 %v5719_v52, %v5701_v61 }
 0x289   : > { %v2404_v0 = vpop.f32.mrf.mxu0 }
 0x28a   : > { %v5733_v43 = vpop.f32.mrf.mxu1 }
 0x28b   : > { %v2406_v55 = vpop.f32.mrf.mxu0 }
 0x28c   : > { %v5735_v50 = vpop.f32.mrf.mxu1 }
 0x28d   : > { %6329 = vst [vmem:[#allocation24_spill] sm:$0xff] %v5735_v50  ;;  %v2412_v1 = vpop.f32.mrf.mxu0 }
 0x28e   : > { %v5737_v20 = vpop.f32.mrf.mxu1 }
 0x28f   : > { %6330 = vst [vmem:[#allocation70_spill] sm:$0xff] %v5737_v20  ;;  %v2414_v46 = vpop.f32.mrf.mxu0 }
 0x290   : > { %v5739_v45 = vpop.f32.mrf.mxu1 }
 0x291   : > { %6331 = vst [vmem:[#allocation66_spill] sm:$0xff] %v5739_v45  ;;  %v2420_v47 = vpop.f32.mrf.mxu0 }
 0x292   : > { %v2538_v13 = vpop.f32.mrf.mxu1 }
 0x293   : > { %v2422_v44 = vpop.f32.mrf.mxu0 }
 0x294   : > { %v2540_v24 = vpop.f32.mrf.mxu1 }
 0x295   : > { %v5741_v60 = vpop.f32.mrf.mxu0 }
 0x296   : > { %v2547_v42 = vpop.f32.mrf.mxu1 }
 0x297   : > { %v5743_v38 = vpop.f32.mrf.mxu0 }
 0x298   : > { %v2549_v21 = vpop.f32.mrf.mxu1 }
 0x299   : > { %v5745_v25 = vpop.f32.mrf.mxu0 }
 0x29a   : > { %v2556_v14 = vpop.f32.mrf.mxu1 }
 0x29b   : > { %v5747_v5 = vpop.f32.mrf.mxu0 }
 0x29c   : > { %v2558_v27 = vpop.f32.mrf.mxu1 }
 0x29d   : > { %v5749_v40 = vpop.f32.mrf.mxu0 }
 0x29e   : > { %v5751_v8 = vpop.f32.mrf.mxu1 }
 0x29f   : > { %v5753_v31 = vpop.f32.mrf.mxu0 }
 0x2a0   : > { %v5755_v29 = vpop.f32.mrf.mxu1 }
 0x2a1   : > { %v5757_v37 = vpop.f32.mrf.mxu0 }
 0x2a2   : > { %6332 = vst [vmem:[#allocation65_spill] sm:$0xff] %v5757_v37  ;;  %v5759_v3 = vpop.f32.mrf.mxu1  ;;  %v2407_v37 = vadd.f32 %v2406_v55, %v2277_v57  ;;  %v2291_v55 = vadd.f32 %v5707_v26, %v5693_v48  ;;  %v2298_v48 = vadd.f32 %v5715_v59, %v5697_v34 }
 0x2a3   : > { %v5761_v10 = vpop.f32.mrf.mxu0 }
 0x2a4   : > { %6333 = vst [vmem:[#allocation68_spill] sm:$0xff] %v5761_v10  ;;  %v5763_v58 = vpop.f32.mrf.mxu1  ;;  %v2405_v10 = vadd.f32 %v2404_v0, %v2275_v54  ;;  %v2541_v23 = vadd.f32 %v2540_v24, %v2407_v37 }
 0x2a5   : > { %v5765_v4 = vpop.f32.mrf.mxu0 }
 0x2a6   : > { %6334 = vst [vmem:[#allocation50_spill] sm:$0xff] %v5765_v4  ;;  %v5767_v63 = vpop.f32.mrf.mxu1  ;;  %v2282_v4 = vadd.f32 %v2281_v35, %v5683_v7 }
 0x2a7   : > { %v5769_v6 = vpop.f32.mrf.mxu0 }
 0x2a8   : > { %6335 = vst [vmem:[#allocation27_spill] sm:$0xff] %v5769_v6  ;;  %v5771_v41 = vpop.f32.mrf.mxu1  ;;  %v2539_v6 = vadd.f32 %v2538_v13, %v2405_v10  ;;  %v2413_v28 = vadd.f32 %v2412_v1, %v2282_v4 }
 0x2a9   : > { %6336 = vst [vmem:[#allocation30_spill] sm:$0xff] %v5771_v41  ;;  %v2685_v36 = vpop.f32.mrf.mxu0 }
 0x2aa   : > { %v5773_v32 = vpop.f32.mrf.mxu1  ;;  %v2548_v54 = vadd.f32 %v2547_v42, %v2413_v28 }
 0x2ab   : > { %6337 = vst [vmem:[#allocation60_spill] sm:$0xff] %v5773_v32  ;;  %v2687_v17 = vpop.f32.mrf.mxu0  ;;  %v2284_v32 = vadd.f32 %v5699_v53, %v5687_v39  ;;  %v2421_v39 = vadd.f32 %v2420_v47, %v2289_v33 }
 0x2ac   : > { %v5776_v45 = vpop.f32.mrf.mxu1  ;;  %v2688_v7 = vadd.f32 %v2687_v17, %v2541_v23 }
 0x2ad   : > { %6338 = vst [vmem:[#allocation59_spill] sm:$0xff] %v5776_v45  ;;  %v2692_v20 = vpop.f32.mrf.mxu0  ;;  %v2686_v45 = vadd.f32 %v2685_v36, %v2539_v6  ;;  %v2415_v0 = vadd.f32 %v2414_v46, %v2284_v32  ;;  %v2423_v46 = vadd.f32 %v2422_v44, %v2291_v55  ;;  %v2557_v42 = vadd.f32 %v2556_v14, %v2421_v39  ;;  %v6341_v39 = vld [vmem:[#allocation65_spill] sm:$0xff] }
 0x2ae   : > { %v5779_v11 = vpop.f32.mrf.mxu1  ;;  %v2693_v1 = vadd.f32 %v2692_v20, %v2548_v54  ;;  %v2429_v20 = vadd.f32 %v5741_v60, %v2296_v18  ;;  %v2431_v44 = vadd.f32 %v5743_v38, %v2298_v48  ;;  %v2310_v38 = vadd.f32 %v5727_v62, %v5709_v19 }
 0x2af   : > { %v2694_v50 = vpop.f32.mrf.mxu0  ;;  %v2550_v53 = vadd.f32 %v2549_v21, %v2415_v0  ;;  %v2559_v47 = vadd.f32 %v2558_v27, %v2423_v46  ;;  %v2437_v27 = vadd.f32 %v5745_v25, %v2303_v15  ;;  %v2312_v25 = vadd.f32 %v5731_v9, %v5713_v16  ;;  %v6345_v46 = vld [vmem:[#allocation68_spill] sm:$0xff] }
 0x2b0   : > { %v5782_v41 = vpop.f32.mrf.mxu1  ;;  %v2566_v14 = vadd.f32 %v5751_v8, %v2429_v20  ;;  %v2568_v32 = vadd.f32 %v5755_v29, %v2431_v44  ;;  %v6347_v20 = vld [vmem:[#allocation69_spill] sm:$0xff] }
 0x2b1   : > { %v2699_v49 = vpop.f32.mrf.mxu0  ;;  %v2695_v10 = vadd.f32 %v2694_v50, %v2550_v53  ;;  %v2575_v23 = vadd.f32 %v5759_v3, %v2437_v27 }
 0x2b2   : > { %v2810_v22 = vpop.f32.mrf.mxu1  ;;  %v2700_v21 = vadd.f32 %v2699_v49, %v2557_v42  ;;  %v2305_v49 = vadd.f32 %v5723_v56, %v5705_v30 }
 0x2b3   : > { %v2811_v35 = vadd.f32 %v2810_v22, %v2686_v45  ;;  %v2701_v57 = vpop.f32.mrf.mxu0  ;;  %v2445_v22 = vadd.f32 %v5749_v40, %v2310_v38  ;;  %v6339_v40 = vld [vmem:[#allocation49_spill] sm:$0xff] }
 0x2b4   : > { %v2812_v13 = vpop.f32.mrf.mxu1  ;;  %v2702_v36 = vadd.f32 %v2701_v57, %v2559_v47  ;;  %v2439_v28 = vadd.f32 %v5747_v5, %v2305_v49  ;;  %v2317_v5 = vadd.f32 %v5733_v43, %v5717_v51  ;;  %v6348_v47 = vld [vmem:[#allocation66_spill] sm:$0xff]  ;;  %v6351_v49 = vld [vmem:[#allocation27_spill] sm:$0xff] }
 0x2b5   : > { %3702 = vst [vmem:[%s5277_s10 + $0x20] sm:$0xff] %v2811_v35  ;;  %v2813_v24 = vadd.f32 %v2812_v13, %v2688_v7  ;;  %v2706_v37 = vpop.f32.mrf.mxu0  ;;  %v2447_v7 = vadd.f32 %v5753_v31, %v2312_v25  ;;  %v2584_v35 = vadd.f32 %v5767_v63, %v2445_v22  ;;  %v6343_v31 = vld [vmem:[#allocation55_spill] sm:$0xff]  ;;  %v6344_v63 = vld [vmem:[#allocation70_spill] sm:$0xff] }
 0x2b6   : > { %v2817_v12 = vpop.f32.mrf.mxu1  ;;  %v2707_v17 = vadd.f32 %v2706_v37, %v2566_v14  ;;  %v2577_v0 = vadd.f32 %v5763_v58, %v2439_v28  ;;  %v6340_v58 = vld [vmem:[#allocation24_spill] sm:$0xff]  ;;  %v2453_v53 = vadd.f32 %v6341_v39, %v2317_v5  ;;  %v2324_v18 = vadd.f32 %v6344_v63, %v6343_v31 }
 0x2b7   : > { %3703 = vst [vmem:[%s5277_s10 + $0x28] sm:$0xff] %v2813_v24  ;;  %v2818_v45 = vadd.f32 %v2817_v12, %v2693_v1  ;;  %v2708_v4 = vpop.f32.mrf.mxu0  ;;  %v2319_v55 = vadd.f32 %v6340_v58, %v6339_v40  ;;  %v6342_v1 = vld [vmem:[#allocation30_spill] sm:$0xff] }
 0x2b8   : > { %v2819_v26 = vpop.f32.mrf.mxu1  ;;  %v2709_v33 = vadd.f32 %v2708_v4, %v2568_v32  ;;  %v2586_v24 = vadd.f32 %v6342_v1, %v2447_v7 }
 0x2b9   : > { %3710 = vst [vmem:[%s5277_s10 + $0x60] sm:$0xff] %v2818_v45  ;;  %v2820_v6 = vadd.f32 %v2819_v26, %v2695_v10  ;;  %v2713_v2 = vpop.f32.mrf.mxu0  ;;  %v2455_v42 = vadd.f32 %v6345_v46, %v2319_v55  ;;  %v6346_v10 = vld [vmem:[#allocation60_spill] sm:$0xff] }
 0x2ba   : > { %v2824_v50 = vpop.f32.mrf.mxu1  ;;  %v2714_v54 = vadd.f32 %v2713_v2, %v2575_v23  ;;  %v2593_v45 = vadd.f32 %v6346_v10, %v2453_v53  ;;  %v6349_v2 = vld [vmem:[#allocation50_spill] sm:$0xff] }
 0x2bb   : > { %3711 = vst [vmem:[%s5277_s10 + $0x68] sm:$0xff] %v2820_v6  ;;  %v2825_v34 = vadd.f32 %v2824_v50, %v2700_v21  ;;  %v2715_v59 = vpop.f32.mrf.mxu0  ;;  %v2326_v21 = vadd.f32 %v6348_v47, %v6347_v20  ;;  %v2461_v15 = vadd.f32 %v6349_v2, %v2324_v18  ;;  %v6350_v50 = vld [vmem:[#allocation59_spill] sm:$0xff] }
 0x2bc   : > { %v2826_v60 = vpop.f32.mrf.mxu1  ;;  %v2716_v57 = vadd.f32 %v2715_v59, %v2577_v0  ;;  %v2595_v44 = vadd.f32 %v6350_v50, %v2455_v42 }
 0x2bd   : > { %3718 = vst [vmem:[%s5277_s10 + $0xa0] sm:$0xff] %v2825_v34  ;;  %v2827_v61 = vadd.f32 %v2826_v60, %v2702_v36  ;;  %v2720_v52 = vpop.f32.mrf.mxu0  ;;  %v2463_v60 = vadd.f32 %v6351_v49, %v2326_v21  ;;  %v2602_v27 = vadd.f32 %v5779_v11, %v2461_v15 }
 0x2be   : > { %v2831_v8 = vpop.f32.mrf.mxu1  ;;  %v2721_v37 = vadd.f32 %v2720_v52, %v2584_v35 }
 0x2bf   : > { %3719 = vst [vmem:[%s5277_s10 + $0xa8] sm:$0xff] %v2827_v61  ;;  %v2832_v30 = vadd.f32 %v2831_v8, %v2707_v17  ;;  %v2722_v56 = vpop.f32.mrf.mxu0  ;;  %v2604_v38 = vadd.f32 %v5782_v41, %v2463_v60 }
 0x2c0   : > { %v2833_v29 = vpop.f32.mrf.mxu1  ;;  %v2723_v4 = vadd.f32 %v2722_v56, %v2586_v24 }
 0x2c1   : > { %3726 = vst [vmem:[%s5277_s10 + $0xe0] sm:$0xff] %v2832_v30  ;;  %v2834_v19 = vadd.f32 %v2833_v29, %v2709_v33  ;;  %v2727_v62 = vpop.f32.mrf.mxu0 }
 0x2c2   : > { %v2838_v3 = vpop.f32.mrf.mxu1  ;;  %v2728_v14 = vadd.f32 %v2727_v62, %v2593_v45 }
 0x2c3   : > { %3727 = vst [vmem:[%s5277_s10 + $0xe8] sm:$0xff] %v2834_v19  ;;  %v2839_v16 = vadd.f32 %v2838_v3, %v2714_v54  ;;  %v2729_v9 = vpop.f32.mrf.mxu0 }
 0x2c4   : > { %v2840_v13 = vpop.f32.mrf.mxu1  ;;  %v2730_v32 = vadd.f32 %v2729_v9, %v2595_v44 }
 0x2c5   : > { %3734 = vst [vmem:[%s5277_s10 + $0x120] sm:$0xff] %v2839_v16  ;;  %v2841_v51 = vadd.f32 %v2840_v13, %v2716_v57  ;;  %v2734_v43 = vpop.f32.mrf.mxu0 }
 0x2c6   : > { %v2845_v12 = vpop.f32.mrf.mxu1  ;;  %v2735_v8 = vadd.f32 %v2734_v43, %v2602_v27 }
 0x2c7   : > { %3735 = vst [vmem:[%s5277_s10 + $0x128] sm:$0xff] %v2841_v51  ;;  %v2846_v48 = vadd.f32 %v2845_v12, %v2721_v37  ;;  %v2736_v26 = vpop.f32.mrf.mxu0 }
 0x2c8   : > { %v2847_v6 = vpop.f32.mrf.mxu1  ;;  %v2737_v30 = vadd.f32 %v2736_v26, %v2604_v38 }
 0x2c9   : > { %3742 = vst [vmem:[%s5277_s10 + $0x160] sm:$0xff] %v2846_v48  ;;  %v2848_v36 = vadd.f32 %v2847_v6, %v2723_v4  ;;  %v5838_v34 = vpop.f32.mrf.mxu0 }
 0x2ca   : > { %v2852_v59 = vpop.f32.mrf.mxu1 }
 0x2cb   : > { %3743 = vst [vmem:[%s5277_s10 + $0x168] sm:$0xff] %v2848_v36  ;;  %v2853_v17 = vadd.f32 %v2852_v59, %v2728_v14  ;;  %v5843_v61 = vpop.f32.mrf.mxu0 }
 0x2cc   : > { %v2854_v52 = vpop.f32.mrf.mxu1 }
 0x2cd   : > { %3750 = vst [vmem:[%s5277_s10 + $0x1a0] sm:$0xff] %v2853_v17  ;;  %v2855_v28 = vadd.f32 %v2854_v52, %v2730_v32  ;;  %v5847_v23 = vpop.f32.mrf.mxu0 }
 0x2ce   : > { %v2859_v33 = vpop.f32.mrf.mxu1 }
 0x2cf   : > { %3751 = vst [vmem:[%s5277_s10 + $0x1a8] sm:$0xff] %v2855_v28  ;;  %v2860_v56 = vadd.f32 %v2859_v33, %v2735_v8  ;;  %v5850_v11 = vpop.f32.mrf.mxu0 }
 0x2d0   : > { %v2861_v25 = vpop.f32.mrf.mxu1 }
 0x2d1   : > { %3758 = vst [vmem:[%s5277_s10 + $0x1e0] sm:$0xff] %v2860_v56  ;;  %v2862_v29 = vadd.f32 %v2861_v25, %v2737_v30  ;;  %v5853_v22 = vpop.f32.mrf.mxu0 }
 0x2d2   : > { %v3108_v0 = vpop.f32.mrf.mxu1 }
 0x2d3   : > { %3759 = vst [vmem:[%s5277_s10 + $0x1e8] sm:$0xff] %v2862_v29  ;;  %v5856_v54 = vpop.f32.mrf.mxu0  ;;  %v3109_v25 = vadd.f32 %v3108_v0, %v5838_v34 }
 0x2d4   : > { %v3110_v41 = vpop.f32.mrf.mxu1 }
 0x2d5   : > { %v5858_v19 = vpop.f32.mrf.mxu0 }
 0x2d6   : > { %v3115_v62 = vpop.f32.mrf.mxu1 }
 0x2d7   : > { %v5860_v5 = vpop.f32.mrf.mxu0 }
 0x2d8   : > { %v5862_v3 = vpop.f32.mrf.mxu1 }
 0x2d9   : > { %v5864_v7 = vpop.f32.mrf.mxu0 }
 0x2da   : > { %v5866_v35 = vpop.f32.mrf.mxu1 }
 0x2db   : > { %v5868_v57 = vpop.f32.mrf.mxu0 }
 0x2dc   : > { %v5870_v16 = vpop.f32.mrf.mxu1 }
 0x2dd   : > { %v5872_v9 = vpop.f32.mrf.mxu0 }
 0x2de   : > { %v5874_v40 = vpop.f32.mrf.mxu1 }
 0x2df   : > { %v5876_v58 = vpop.f32.mrf.mxu0 }
 0x2e0   : > { %v5878_v55 = vpop.f32.mrf.mxu1 }
 0x2e1   : > { %v5880_v13 = vpop.f32.mrf.mxu0 }
 0x2e2   : > { %v5882_v39 = vpop.f32.mrf.mxu1 }
 0x2e3   : > { %v5884_v53 = vpop.f32.mrf.mxu0 }
 0x2e4   : > { %6352 = vst [vmem:[#allocation61_spill] sm:$0xff] %v5884_v53  ;;  %v5886_v1 = vpop.f32.mrf.mxu1 }
 0x2e5   : > { %v5888_v24 = vpop.f32.mrf.mxu0 }
 0x2e6   : > { %6353 = vst [vmem:[#allocation34_spill] sm:$0xff] %v5888_v24  ;;  %v5890_v37 = vpop.f32.mrf.mxu1 }
 0x2e7   : > { %v5892_v51 = vpop.f32.mrf.mxu0 }
 0x2e8   : > { %6354 = vst [vmem:[#allocation37_spill] sm:$0xff] %v5892_v51  ;;  %v5894_v43 = vpop.f32.mrf.mxu1  ;;  %v3111_v51 = vadd.f32 %v3110_v41, %v5843_v61  ;;  %v3123_v61 = vadd.f32 %v5866_v35, %v5853_v22  ;;  %v3130_v22 = vadd.f32 %v5874_v40, %v5858_v19  ;;  %v3137_v40 = vadd.f32 %v5882_v39, %v5864_v7 }
 0x2e9   : > { %v3238_v31 = vpop.f32.mrf.mxu0 }
 0x2ea   : > { %v5896_v63 = vpop.f32.mrf.mxu1 }
 0x2eb   : > { %v3240_v18 = vpop.f32.mrf.mxu0 }
 0x2ec   : > { %v5898_v12 = vpop.f32.mrf.mxu1 }
 0x2ed   : > { %6355 = vst [vmem:[#allocation40_spill] sm:$0xff] %v5898_v12  ;;  %v3246_v46 = vpop.f32.mrf.mxu0 }
 0x2ee   : > { %v5900_v42 = vpop.f32.mrf.mxu1 }
 0x2ef   : > { %6356 = vst [vmem:[#allocation42_spill] sm:$0xff] %v5900_v42  ;;  %v3248_v10 = vpop.f32.mrf.mxu0 }
 0x2f0   : > { %v5902_v45 = vpop.f32.mrf.mxu1 }
 0x2f1   : > { %6357 = vst [vmem:[#allocation43_spill] sm:$0xff] %v5902_v45  ;;  %v3254_v4 = vpop.f32.mrf.mxu0 }
 0x2f2   : > { %v3372_v48 = vpop.f32.mrf.mxu1 }
 0x2f3   : > { %v3256_v26 = vpop.f32.mrf.mxu0 }
 0x2f4   : > { %v3374_v20 = vpop.f32.mrf.mxu1 }
 0x2f5   : > { %v5904_v47 = vpop.f32.mrf.mxu0 }
 0x2f6   : > { %v3381_v21 = vpop.f32.mrf.mxu1 }
 0x2f7   : > { %v5906_v6 = vpop.f32.mrf.mxu0 }
 0x2f8   : > { %v3383_v2 = vpop.f32.mrf.mxu1 }
 0x2f9   : > { %v5908_v15 = vpop.f32.mrf.mxu0 }
 0x2fa   : > { %v3390_v50 = vpop.f32.mrf.mxu1 }
 0x2fb   : > { %v5910_v44 = vpop.f32.mrf.mxu0 }
 0x2fc   : > { %v3392_v14 = vpop.f32.mrf.mxu1 }
 0x2fd   : > { %v5912_v36 = vpop.f32.mrf.mxu0 }
 0x2fe   : > { %v5914_v59 = vpop.f32.mrf.mxu1 }
 0x2ff   : > { %v5916_v49 = vpop.f32.mrf.mxu0 }
 0x300   : > { %v5918_v60 = vpop.f32.mrf.mxu1 }
 0x301   : > { %v5920_v27 = vpop.f32.mrf.mxu0 }
 0x302   : > { %6358 = vst [vmem:[#allocation18_spill] sm:$0xff] %v5920_v27  ;;  %v5922_v32 = vpop.f32.mrf.mxu1  ;;  %v3241_v27 = vadd.f32 %v3240_v18, %v3111_v51  ;;  %v3125_v18 = vadd.f32 %v5870_v16, %v5856_v54  ;;  %v3132_v54 = vadd.f32 %v5878_v55, %v5860_v5 }
 0x303   : > { %v5924_v17 = vpop.f32.mrf.mxu0 }
 0x304   : > { %6359 = vst [vmem:[#allocation20_spill] sm:$0xff] %v5924_v17  ;;  %v5926_v52 = vpop.f32.mrf.mxu1  ;;  %v3239_v17 = vadd.f32 %v3238_v31, %v3109_v25  ;;  %v3375_v0 = vadd.f32 %v3374_v20, %v3241_v27 }
 0x305   : > { %v5928_v38 = vpop.f32.mrf.mxu0 }
 0x306   : > { %6360 = vst [vmem:[#allocation22_spill] sm:$0xff] %v5928_v38  ;;  %v5930_v8 = vpop.f32.mrf.mxu1  ;;  %v3116_v38 = vadd.f32 %v3115_v62, %v5847_v23 }
 0x307   : > { %v5932_v28 = vpop.f32.mrf.mxu0 }
 0x308   : > { %6361 = vst [vmem:[#allocation19_spill] sm:$0xff] %v5932_v28  ;;  %v5934_v33 = vpop.f32.mrf.mxu1  ;;  %v3373_v28 = vadd.f32 %v3372_v48, %v3239_v17  ;;  %v3247_v34 = vadd.f32 %v3246_v46, %v3116_v38 }
 0x309   : > { %6362 = vst [vmem:[#allocation23_spill] sm:$0xff] %v5934_v33  ;;  %v3519_v30 = vpop.f32.mrf.mxu0 }
 0x30a   : > { %v5936_v56 = vpop.f32.mrf.mxu1  ;;  %v3382_v25 = vadd.f32 %v3381_v21, %v3247_v34 }
 0x30b   : > { %6363 = vst [vmem:[#allocation21_spill] sm:$0xff] %v5936_v56  ;;  %v3521_v29 = vpop.f32.mrf.mxu0  ;;  %v3118_v56 = vadd.f32 %v5862_v3, %v5850_v11  ;;  %v3255_v11 = vadd.f32 %v3254_v4, %v3123_v61 }
 0x30c   : > { %v5939_v45 = vpop.f32.mrf.mxu1  ;;  %v3522_v23 = vadd.f32 %v3521_v29, %v3375_v0 }
 0x30d   : > { %6364 = vst [vmem:[#allocation28_spill] sm:$0xff] %v5939_v45  ;;  %v3526_v42 = vpop.f32.mrf.mxu0  ;;  %v3520_v45 = vadd.f32 %v3519_v30, %v3373_v28  ;;  %v3249_v31 = vadd.f32 %v3248_v10, %v3118_v56  ;;  %v3257_v10 = vadd.f32 %v3256_v26, %v3125_v18  ;;  %v3391_v21 = vadd.f32 %v3390_v50, %v3255_v11  ;;  %v6367_v11 = vld [vmem:[#allocation18_spill] sm:$0xff] }
 0x30e   : > { %v5942_v24 = vpop.f32.mrf.mxu1  ;;  %v3527_v46 = vadd.f32 %v3526_v42, %v3382_v25  ;;  %v3263_v42 = vadd.f32 %v5904_v47, %v3130_v22  ;;  %v3265_v26 = vadd.f32 %v5906_v6, %v3132_v54  ;;  %v3144_v6 = vadd.f32 %v5890_v37, %v5872_v9  ;;  %v6373_v54 = vld [vmem:[#allocation37_spill] sm:$0xff] }
 0x30f   : > { %v3528_v12 = vpop.f32.mrf.mxu0  ;;  %v3384_v3 = vadd.f32 %v3383_v2, %v3249_v31  ;;  %v3393_v4 = vadd.f32 %v3392_v14, %v3257_v10  ;;  %v3271_v14 = vadd.f32 %v5908_v15, %v3137_v40  ;;  %v3146_v15 = vadd.f32 %v5894_v43, %v5876_v58  ;;  %v6365_v43 = vld [vmem:[#allocation61_spill] sm:$0xff] }
 0x310   : > { %v5945_v33 = vpop.f32.mrf.mxu1  ;;  %v3400_v50 = vadd.f32 %v5914_v59, %v3263_v42  ;;  %v3402_v56 = vadd.f32 %v5918_v60, %v3265_v26 }
 0x311   : > { %v3533_v53 = vpop.f32.mrf.mxu0  ;;  %v3529_v17 = vadd.f32 %v3528_v12, %v3384_v3  ;;  %v3409_v0 = vadd.f32 %v5922_v32, %v3271_v14 }
 0x312   : > { %v3644_v41 = vpop.f32.mrf.mxu1  ;;  %v3534_v2 = vadd.f32 %v3533_v53, %v3391_v21  ;;  %v3139_v53 = vadd.f32 %v5886_v1, %v5868_v57  ;;  %v6372_v21 = vld [vmem:[#allocation21_spill] sm:$0xff] }
 0x313   : > { %v3645_v62 = vadd.f32 %v3644_v41, %v3520_v45  ;;  %v3535_v51 = vpop.f32.mrf.mxu0  ;;  %v3279_v41 = vadd.f32 %v5912_v36, %v3144_v6  ;;  %v6366_v36 = vld [vmem:[#allocation40_spill] sm:$0xff] }
 0x314   : > { %v3646_v48 = vpop.f32.mrf.mxu1  ;;  %v3536_v30 = vadd.f32 %v3535_v51, %v3393_v4  ;;  %v3273_v34 = vadd.f32 %v5910_v44, %v3139_v53  ;;  %v3151_v44 = vadd.f32 %v5896_v63, %v5880_v13  ;;  %v6369_v63 = vld [vmem:[#allocation34_spill] sm:$0xff]  ;;  %v6376_v40 = vld [vmem:[#allocation28_spill] sm:$0xff] }
 0x315   : > { %3704 = vst [vmem:[%s5277_s10 + $0x30] sm:$0xff] %v3645_v62  ;;  %v3647_v20 = vadd.f32 %v3646_v48, %v3522_v23  ;;  %v3540_v27 = vpop.f32.mrf.mxu0  ;;  %v3281_v23 = vadd.f32 %v5916_v49, %v3146_v15  ;;  %v3418_v62 = vadd.f32 %v5930_v8, %v3279_v41  ;;  %v6370_v49 = vld [vmem:[#allocation42_spill] sm:$0xff] }
 0x316   : > { %v3651_v35 = vpop.f32.mrf.mxu1  ;;  %v3541_v29 = vadd.f32 %v3540_v27, %v3400_v50  ;;  %v3411_v31 = vadd.f32 %v5926_v52, %v3273_v34  ;;  %v3153_v52 = vadd.f32 %v6366_v36, %v6365_v43  ;;  %v3287_v3 = vadd.f32 %v6367_v11, %v3151_v44 }
 0x317   : > { %3705 = vst [vmem:[%s5277_s10 + $0x38] sm:$0xff] %v3647_v20  ;;  %v3652_v45 = vadd.f32 %v3651_v35, %v3527_v46  ;;  %v3542_v38 = vpop.f32.mrf.mxu0  ;;  %v6368_v46 = vld [vmem:[#allocation23_spill] sm:$0xff]  ;;  %v3158_v8 = vadd.f32 %v6370_v49, %v6369_v63  ;;  %v6371_v35 = vld [vmem:[#allocation20_spill] sm:$0xff] }
 0x318   : > { %v3653_v16 = vpop.f32.mrf.mxu1  ;;  %v3543_v61 = vadd.f32 %v3542_v38, %v3402_v56  ;;  %v3420_v20 = vadd.f32 %v6368_v46, %v3281_v23  ;;  %v3289_v10 = vadd.f32 %v6371_v35, %v3153_v52 }
 0x319   : > { %3712 = vst [vmem:[%s5277_s10 + $0x70] sm:$0xff] %v3652_v45  ;;  %v3654_v28 = vadd.f32 %v3653_v16, %v3529_v17  ;;  %v3547_v19 = vpop.f32.mrf.mxu0  ;;  %v3427_v17 = vadd.f32 %v6372_v21, %v3287_v3  ;;  %v6374_v16 = vld [vmem:[#allocation43_spill] sm:$0xff] }
 0x31a   : > { %v3658_v12 = vpop.f32.mrf.mxu1  ;;  %v3548_v25 = vadd.f32 %v3547_v19, %v3409_v0  ;;  %v3160_v42 = vadd.f32 %v6374_v16, %v6373_v54 }
 0x31b   : > { %3713 = vst [vmem:[%s5277_s10 + $0x78] sm:$0xff] %v3654_v28  ;;  %v3659_v5 = vadd.f32 %v3658_v12, %v3534_v2  ;;  %v3549_v55 = vpop.f32.mrf.mxu0  ;;  %v6375_v28 = vld [vmem:[#allocation22_spill] sm:$0xff]  ;;  %v3429_v12 = vadd.f32 %v6376_v40, %v3289_v10 }
 0x31c   : > { %v3660_v47 = vpop.f32.mrf.mxu1  ;;  %v3550_v51 = vadd.f32 %v3549_v55, %v3411_v31  ;;  %v3295_v19 = vadd.f32 %v6375_v28, %v3158_v8 }
 0x31d   : > { %3720 = vst [vmem:[%s5277_s10 + $0xb0] sm:$0xff] %v3659_v5  ;;  %v3661_v7 = vadd.f32 %v3660_v47, %v3536_v30  ;;  %v3554_v39 = vpop.f32.mrf.mxu0  ;;  %v6377_v5 = vld [vmem:[#allocation19_spill] sm:$0xff] }
 0x31e   : > { %v3665_v59 = vpop.f32.mrf.mxu1  ;;  %v3555_v27 = vadd.f32 %v3554_v39, %v3418_v62  ;;  %v3297_v55 = vadd.f32 %v6377_v5, %v3160_v42  ;;  %v3436_v53 = vadd.f32 %v5942_v24, %v3295_v19 }
 0x31f   : > { %3721 = vst [vmem:[%s5277_s10 + $0xb8] sm:$0xff] %v3661_v7  ;;  %v3666_v57 = vadd.f32 %v3665_v59, %v3541_v29  ;;  %v3556_v1 = vpop.f32.mrf.mxu0 }
 0x320   : > { %v3667_v60 = vpop.f32.mrf.mxu1  ;;  %v3557_v45 = vadd.f32 %v3556_v1, %v3420_v20  ;;  %v3438_v7 = vadd.f32 %v5945_v33, %v3297_v55 }
 0x321   : > { %3728 = vst [vmem:[%s5277_s10 + $0xf0] sm:$0xff] %v3666_v57  ;;  %v3668_v9 = vadd.f32 %v3667_v60, %v3543_v61  ;;  %v3561_v37 = vpop.f32.mrf.mxu0 }
 0x322   : > { %v3672_v32 = vpop.f32.mrf.mxu1  ;;  %v3562_v26 = vadd.f32 %v3561_v37, %v3427_v17 }
 0x323   : > { %3729 = vst [vmem:[%s5277_s10 + $0xf8] sm:$0xff] %v3668_v9  ;;  %v3673_v58 = vadd.f32 %v3672_v32, %v3548_v25  ;;  %v3563_v18 = vpop.f32.mrf.mxu0 }
 0x324   : > { %v3674_v48 = vpop.f32.mrf.mxu1  ;;  %v3564_v47 = vadd.f32 %v3563_v18, %v3429_v12 }
 0x325   : > { %3736 = vst [vmem:[%s5277_s10 + $0x130] sm:$0xff] %v3673_v58  ;;  %v3675_v13 = vadd.f32 %v3674_v48, %v3550_v51  ;;  %v3568_v4 = vpop.f32.mrf.mxu0 }
 0x326   : > { %v3679_v22 = vpop.f32.mrf.mxu1  ;;  %v3569_v39 = vadd.f32 %v3568_v4, %v3436_v53 }
 0x327   : > { %3737 = vst [vmem:[%s5277_s10 + $0x138] sm:$0xff] %v3675_v13  ;;  %v3680_v38 = vadd.f32 %v3679_v22, %v3555_v27  ;;  %v3570_v56 = vpop.f32.mrf.mxu0 }
 0x328   : > { %v3681_v2 = vpop.f32.mrf.mxu1  ;;  %v3571_v34 = vadd.f32 %v3570_v56, %v3438_v7 }
 0x329   : > { %3744 = vst [vmem:[%s5277_s10 + $0x170] sm:$0xff] %v3680_v38  ;;  %v3682_v50 = vadd.f32 %v3681_v2, %v3557_v45 }
 0x32a   : > { %v3686_v30 = vpop.f32.mrf.mxu1 }
 0x32b   : > { %3745 = vst [vmem:[%s5277_s10 + $0x178] sm:$0xff] %v3682_v50  ;;  %v3687_v14 = vadd.f32 %v3686_v30, %v3562_v26 }
 0x32c   : > { %v3688_v29 = vpop.f32.mrf.mxu1 }
 0x32d   : > { %3752 = vst [vmem:[%s5277_s10 + $0x1b0] sm:$0xff] %v3687_v14  ;;  %v3689_v6 = vadd.f32 %v3688_v29, %v3564_v47 }
 0x32e   : > { %v3693_v59 = vpop.f32.mrf.mxu1 }
 0x32f   : > { %3753 = vst [vmem:[%s5277_s10 + $0x1b8] sm:$0xff] %v3689_v6  ;;  %v3694_v0 = vadd.f32 %v3693_v59, %v3569_v39  ;;  %3769 = sbr.rel (!%p4382_p4) target bundleno = 849 (0x351), region = 44 }
 0x330   : > { %v3695_v61 = vpop.f32.mrf.mxu1 }
 0x331   : > { %3760 = vst [vmem:[%s5277_s10 + $0x1f0] sm:$0xff] %v3694_v0  ;;  %v3696_v57 = vadd.f32 %v3695_v61, %v3571_v34 }
 0x333   : > { %3761 = vst [vmem:[%s5277_s10 + $0x1f8] sm:$0xff] %v3696_v57 }
 0x334   : > { %s6402_s11 = smov (!%p3772_p7, %s3771_s11), 8 }
 0x335   : > { %s6016_s12 = sshll.u32 %s6402_s11, 10 }
 0x336   : > { %s3776_s29 = ssub.s32 8192, %s6016_s12 }
 0x337   : > { %3777 = vsyncadd %s3763_s5, %s3776_s29  ;;  %p3925_p13 = scmp.ne.s32.totalorder %s6016_s12, 0  ;;  %s3939_s27 = smul.u32 136, %s4210_s19 }
 0x338   : > { %s3927_s18 = sshll.u32 %s6402_s11, 3  ;;  %s3785_s24 = sshll.u32 %s5277_s10, 4  ;;  %s6025_s24 = int_to_ptr.vmem [resolvable:$true] %s3785_s24 }
 0x339   : > { %s3780_s23 = sadd.s32 %s3939_s27, %s3923_s28  ;;  %s6378_s30 = sld [smem:[#allocation72_spill]] }
 0x33a   : > { %s3926_s6 = sshll.u32 %s3780_s23, 7  ;;  %s4096_s0 = scalar_lea.vmem %s6025_s24, %s6016_s12 }
 0x33b   : > { %p4097_p0 = scmp.ne.s32.totalorder %s6025_s24, %s4096_s0  ;;  %s4228_s19 = smov [#allocation7]  }
 0x33c   : > { %s4100_s15 = sshll.u32 %s4228_s19, 4  ;;  %s4101_s15 = int_to_ptr.vmem [resolvable:$false] %s4100_s15 }
 0x33d   : > { %p4098_p4 = pnand %p4097_p0, %p3925_p13  ;;  %s4102_s25 = scalar_lea.vmem %s4101_s15, 16384 }
 0x33e   : > { %p4103_p2 = scmp.lt.s32.totalorder %s6025_s24, %s4101_s15  ;;  %p4104_p1 = scmp.lt.s32.totalorder %s4102_s25, %s4096_s0 }
 0x33f   : > { %s6030_s8 = scalar_lea.hbm %s6378_s30, %s3926_s6  ;;  %p4099_p9 = pneg %p4098_p4 }
 0x340   : > { %p4105_p3 = por %p4104_p1, %p4103_p2 }
 0x342   : > { %p4106_p5 = pnand %p4105_p3, %p4099_p9 }
 0x344   : > { %4109 = shalt.err (!%p4106_p5)
}
 0x345   : > { %s4110_s3 = scalar_lea.hbm %s6030_s8, %s6016_s12  ;;  %s4114_s10 = scalar_lea.hbm %s6378_s30, 34816 }
 0x346   : > { %p4111_p6 = scmp.ne.s32.totalorder %s6030_s8, %s4110_s3  ;;  %p4115_p12 = scmp.lt.s32.totalorder %s6030_s8, %s6378_s30 }
 0x347   : > { %p4116_p8 = scmp.lt.s32.totalorder %s4114_s10, %s4110_s3 }
 0x348   : > { %p4112_p10 = pnand %p4111_p6, %p3925_p13 }
 0x349   : > { %p4117_p7 = por %p4116_p8, %p4115_p12 }
 0x34a   : > { %p4113_p11 = pneg %p4112_p10 }
 0x34c   : > { %p4118_p0 = pnand %p4117_p7, %p4113_p11 }
 0x34e   : > { %4121 = shalt.err (!%p4118_p0)
}
 0x34f   : > { %s4229_s27 = smov 1024   ;;  %s4230_s23 = smov 2176  }
 0x350   : > { %3791 = dma.vmem_to_hbm [thread:$0]  (%p3925_p13), %s6025_s24, %s6016_s12, %s6030_s8, %s3763_s5, %s4229_s27, %s4230_s23, %s3927_s18  }
 0x351 PF: > { %s6379_s6 = sld [smem:[#allocation11_spill]]  ;;  %p3948_p4 = scmp.ge.s32.totalorder %s4222_s22, 2 }
 0x352   : > { %s6380_s7 = sld [smem:[#allocation17_spill]] }
 0x357   : > { %s3800_s20 = sand.u32 1, %s6379_s6  }
 0x358   : > { %p6381_p9 = scmp.ne.s32.totalorder %s6380_s7, 0  ;;  %s3801_s0 = scalar_lea.sflag [#allocation4], %s3800_s20 }
 0x35a   : > { %p3945_p2 = pnand %p3948_p4, %p6381_p9 }
 0x35c   : > { %p3946_p1 = pneg %p3945_p2 }
 0x35e   : > { %4175 = dma.done.wait (%p3946_p1), %s3801_s0, 8192  }
 0x35f   : > { %4177 = vsyncadd (%p3946_p1), %s3801_s0, 4294959104  ;;  %s22_s22 = sadd.s32 1, %s4222_s22   ;;  %s6382_s4 = sld [smem:[#allocation16_spill]] }
 0x360   : > { %p19_p3 = scmp.ge.s32.totalorder %s22_s22, 8   ;;  %s6383_s5 = sld [smem:[#allocation15_spill]] }
 0x361   : > { %s6384_s18 = sld [smem:[#allocation12_spill]]  ;;  %s6387_s12 = smov %s4186_s13 }
 0x362   : > { %s6385_s20 = sld [smem:[#allocation13_spill]]  ;;  %s6388_s13 = smov %s4190_s14 }
 0x363   : > { %s6386_s11 = sld [smem:[#allocation14_spill]]  ;;  %s6390_s15 = smov %s4198_s16 }
 0x364   : > { %s6391_s16 = smov %s4202_s17  ;;  %s6393_s19 = smov %s4218_s21 }
 0x365   : > { %s6389_s14 = smov %s6382_s4  ;;  %21 = sbr.rel (!%p19_p3) target bundleno = 14 (0xe), region = 90 }
 0x366   : > { %s6392_s17 = smov %s6383_s5 }
 0x369   : > { %s6394_s21 = smov %s6386_s11 }
 0x36a   :  { %3806 = vsyncpa [#allocation3], 1 }
 0x36b   :  { %3808 = vsyncpa [#allocation3 + $0x1], 1 }
 0x36c   :  { %3809 = vsyncpa [#allocation6], 1 }
 0x36d   :  { %3811 = vsyncpa [#allocation6 + $0x1], 1 }
 0x36e   :  { %3812 = vsyncpa [#allocation4], 1 }
 0x36f   :  { %3814 = vsyncpa [#allocation4 + $0x1], 1 }

</bundles_post_ra>
